<compile_context>
chip_gen: v6e
topology: v6e:2x2x1
jax: 0.10.0
libtpu: 0.0.40
codegen_flags: <defaults>
</compile_context>

<pallas_src>
import functools

import jax
import jax.numpy as jnp
from jax.experimental import pallas as pl
from jax.experimental.pallas import tpu as pltpu

EPS = 1e-5


def _round_up(v, m):
    return (v + m - 1) // m * m


def _side_three_kernel(x_ref, mask_ref, w1_ref, g1_ref, be1_ref, w2_ref, b2_ref,
                       out_ref, *, cmid, wp, off, m_out, inv_count):
    # ---- fused (nearest-x2 upsample + 3x3 conv): per output parity p = 2*py + px, four
    # ---- accumulating bf16 MXU dots on lane-shifted views of the flat original-res input.
    # NOTE: views at pad-ring / lane-padding output positions read margin zeros or the
    # neighbouring image; those positions are excluded from the BN stats by `mask_ref`
    # and cropped off in the wrapper, so the garbage never propagates.
    accs = [None, None, None, None]
    for dr in (-1, 0, 1):
        for dc in (-1, 0, 1):
            d = dr * wp + dc
            v = x_ref[:, off + d: off + d + m_out]            # (Cin, M) bf16 view
            for py in (0, 1):
                ry = dr + 1 - py                              # local row tap of parity py
                if ry not in (0, 1):
                    continue
                for px in (0, 1):
                    rx = dc + 1 - px                          # local col tap of parity px
                    if rx not in (0, 1):
                        continue
                    p = 2 * py + px
                    t = (p * 2 + ry) * 2 + rx                 # row block inside w1_ref
                    part = jnp.dot(w1_ref[t * cmid:(t + 1) * cmid, :], v,
                                   preferred_element_type=jnp.float32)
                    accs[p] = part if accs[p] is None else accs[p] + part

    # ---- BatchNorm2d (training mode, biased variance) over all 4 parities.  Lane
    # ---- reductions ride the MXU (matmul against the mask column broadcast to 128
    # ---- lanes); one-pass E[x^2]-E[x]^2 with f32 accumulation, folded into one FMA.
    mask = jnp.broadcast_to(mask_ref[...], (m_out, 128))      # (M, 128) f32, cols identical
    s1 = jnp.zeros((cmid, 128), jnp.float32)
    s2 = jnp.zeros((cmid, 128), jnp.float32)
    for y in accs:
        s1 = s1 + jnp.dot(y, mask, preferred_element_type=jnp.float32)
        s2 = s2 + jnp.dot(y * y, mask, preferred_element_type=jnp.float32)
    mean = s1[:, 0:1] * inv_count                             # (Cmid, 1)
    var = jnp.maximum(s2[:, 0:1] * inv_count - mean * mean, 0.0)
    scale = g1_ref[...] * jax.lax.rsqrt(var + EPS)            # (Cmid, 1)
    shift = be1_ref[...] - mean * scale
    # conv bias intentionally omitted: it cancels exactly under train-mode BatchNorm.

    # ---- ReLU + 1x1 side_output conv (+ bias); output stays lane-dense per parity ----
    w2 = w2_ref[...]                                          # (Cout, Cmid) bf16
    b2 = b2_ref[...]                                          # (Cout, 1)  f32
    for p in range(4):
        h = jnp.maximum(accs[p] * scale + shift, 0.0).astype(jnp.bfloat16)
        out = jnp.dot(w2, h, preferred_element_type=jnp.float32) + b2
        out_ref[p] = out.astype(out_ref.dtype)


def side_three_forward(x_nchw, params):
    """x_nchw: (N, in_ch, H, W) float32.  Returns (N, out_ch, 2H, 2W) float32."""
    w1, b1, g1, be1, w2, b2 = params
    del b1  # conv bias before train-mode BatchNorm cancels (mean absorbs it)
    N, Cin, H, W = x_nchw.shape
    Cmid = w1.shape[0]
    Cout = w2.shape[0]
    Hp, Wp = H + 2, W + 2                    # original-res grid + zero pad ring of 1
    Mp = N * Hp * Wp                         # flattened padded positions (per parity)
    M_OUT = _round_up(Mp, 128)               # lane-dense compute width
    OFF = _round_up(Wp + 1, 128)             # 128-aligned left margin; taps need >= Wp+1
    assert OFF >= Wp + 1
    X_W = _round_up(OFF + M_OUT + Wp + 1, 128)

    # ---- layout plumbing on the ORIGINAL-resolution tensor (no 4x upsampled
    # ---- intermediate, zero FLOPs): channels -> sublanes, flat (N,Hp,Wp) -> lanes, bf16.
    xp = jnp.pad(jnp.transpose(x_nchw, (1, 0, 2, 3)), ((0, 0), (0, 0), (1, 1), (1, 1)))
    x_flat = xp.reshape(Cin, Mp)
    x_ext = jnp.pad(x_flat, ((0, 0), (OFF, X_W - OFF - Mp))).astype(jnp.bfloat16)

    # ---- sub-pixel decomposition of (nearest-x2 upsample) o (3x3 conv, pad=1): output
    # parity (py, px) is a 2x2 conv on the original-res padded input whose taps are
    # partial sums of the 3x3 weights.  Tap order must match the kernel's indexing.
    groups = (((0,), (1, 2)), ((0, 1), (2,)))   # [parity][local tap] -> original 3x3 taps
    w_taps = []
    for py in range(2):
        for px in range(2):
            for ry in range(2):
                for rx in range(2):
                    w_taps.append(sum(w1[:, :, ky, kx]
                                      for ky in groups[py][ry] for kx in groups[px][rx]))
    w1_mat = jnp.concatenate(w_taps, axis=0).astype(jnp.bfloat16)     # (16*Cmid, Cin)
    w2_mat = w2.reshape(Cout, Cmid).astype(jnp.bfloat16)

    # validity-mask column: flat padded position is a real (non-pad) pixel.  Pad-ring and
    # lane-padding positions may read cross-image / margin data inside the kernel; that is
    # safe ONLY because they are masked out of the BN stats here and cropped off below.
    idx = jnp.arange(M_OUT)
    rem = idx % (Hp * Wp)
    yy, xx = rem // Wp, rem % Wp
    valid = (idx < Mp) & (yy >= 1) & (yy <= H) & (xx >= 1) & (xx <= W)
    mask_col = valid.astype(jnp.float32)[:, None]                     # (M_OUT, 1)

    kernel = functools.partial(_side_three_kernel, cmid=Cmid, wp=Wp, off=OFF,
                               m_out=M_OUT, inv_count=1.0 / (4 * N * H * W))
    vmem = pl.BlockSpec(memory_space=pltpu.MemorySpace.VMEM)
    # TODO(synk): for large N*H*W add a lane-tiled grid (512-2048 lanes/tile, 'parallel'
    # spatial axis for v7x's 2 TensorCores, 'arbitrary' BN-stats axis with per-core partial
    # sums + a second normalize pass) and set vmem_limit_bytes for v7x's 64 MiB VMEM; at
    # these shapes a single invocation uses well under 1 MiB of VMEM.
    out_flat = pl.pallas_call(
        kernel,
        out_shape=jax.ShapeDtypeStruct((4, Cout, M_OUT), jnp.float32),
        in_specs=[vmem] * 7,
        out_specs=vmem,
    )(x_ext, mask_col, w1_mat, g1.reshape(Cmid, 1), be1.reshape(Cmid, 1),
      w2_mat, b2.reshape(Cout, 1))

    # un-interleave parities: (2*py+px, Cout, Mp) -> (N, Cout, 2H, 2W)   (layout only)
    out = out_flat[:, :, :Mp].reshape(2, 2, Cout, N, Hp, Wp)[:, :, :, :, 1:H + 1, 1:W + 1]
    out = jnp.transpose(out, (3, 2, 4, 0, 5, 1)).reshape(N, Cout, 2 * H, 2 * W)
    return out


def make_params(key, in_channels, out_channels):
    """Deterministic synthetic parameters with PyTorch layouts."""
    cmid = in_channels // 2   # Side_block output channels; side_output hardcodes 32
    assert cmid == 32, "side_three's side_output expects 32 = in_channels // 2 channels"
    k = jax.random.split(key, 6)
    w1 = jax.random.normal(k[0], (cmid, in_channels, 3, 3), jnp.float32) * 0.05
    b1 = jax.random.normal(k[1], (cmid,), jnp.float32) * 0.1
    g1 = 1.0 + 0.1 * jax.random.normal(k[2], (cmid,), jnp.float32)
    be1 = 0.1 * jax.random.normal(k[3], (cmid,), jnp.float32)
    w2 = jax.random.normal(k[4], (out_channels, cmid, 1, 1), jnp.float32) * 0.1
    b2 = jax.random.normal(k[5], (out_channels,), jnp.float32) * 0.1
    return (w1, b1, g1, be1, w2, b2)


def reference_side_three(x_nchw, params):
    """Pure-JAX f32 reference mirroring the PyTorch train-mode forward."""
    w1, b1, g1, be1, w2, b2 = params
    N, Cin, H, W = x_nchw.shape
    xu = jnp.broadcast_to(x_nchw[:, :, :, None, :, None],
                          (N, Cin, H, 2, W, 2)).reshape(N, Cin, 2 * H, 2 * W)
    y = jax.lax.conv_general_dilated(
        xu, w1, window_strides=(1, 1), padding=((1, 1), (1, 1)),
        dimension_numbers=("NCHW", "OIHW", "NCHW"),
        precision=jax.lax.Precision.HIGHEST)
    y = y + b1[None, :, None, None]
    mean = jnp.mean(y, axis=(0, 2, 3), keepdims=True)
    var = jnp.mean((y - mean) ** 2, axis=(0, 2, 3), keepdims=True)
    y = (y - mean) * (g1[None, :, None, None] * jax.lax.rsqrt(var + EPS)) \
        + be1[None, :, None, None]
    y = jnp.maximum(y, 0.0)
    out = jax.lax.conv_general_dilated(
        y, w2, window_strides=(1, 1), padding=((0, 0), (0, 0)),
        dimension_numbers=("NCHW", "OIHW", "NCHW"),
        precision=jax.lax.Precision.HIGHEST)
    return out + b2[None, :, None, None]


if __name__ == "__main__":
    key = jax.random.PRNGKey(0)
    kx, kp = jax.random.split(key)

    # in_channels must be 64: side_output hardcodes 32 (= in_channels // 2) input channels.
    N, Cin, Cout, H, W = 2, 64, 8, 8, 8
    x = jax.random.normal(kx, (N, Cin, H, W), jnp.float32)
    params = make_params(kp, Cin, Cout)

    y = side_three_forward(x, params)
    y = jax.block_until_ready(y)

    y_ref = reference_side_three(x, params)
    assert y.shape == (N, Cout, 2 * H, 2 * W)
    max_err = float(jnp.max(jnp.abs(y - y_ref)))
    # bf16 MXU operands in the kernel vs. an f32 (precision=HIGHEST) reference.
    assert jnp.allclose(y, y_ref, atol=3e-2, rtol=2e-2), max_err

    print("KERNEL_OK")
</pallas_src>

<mosaic_0001>
module attributes {stable_mosaic.version = 11 : i64} {
  func.func @_side_three_kernel(%arg0: memref<64x512xbf16, #tpu.memory_space<vmem>>, %arg1: memref<256x1xf32, #tpu.memory_space<vmem>>, %arg2: memref<512x64xbf16, #tpu.memory_space<vmem>>, %arg3: memref<32x1xf32, #tpu.memory_space<vmem>>, %arg4: memref<32x1xf32, #tpu.memory_space<vmem>>, %arg5: memref<8x32xbf16, #tpu.memory_space<vmem>>, %arg6: memref<8x1xf32, #tpu.memory_space<vmem>>, %arg7: memref<4x8x256xf32, #tpu.memory_space<vmem>>) attributes {dimension_semantics = [], scalar_prefetch = 0 : i64, scratch_operands = 0 : i64, tpu.core_type = #tpu.core_type<tc>} {
    %c0 = arith.constant 0 : index
    %c117 = arith.constant 117 : index
    %0 = vector.load %arg0[%c0, %c117] : memref<64x512xbf16, #tpu.memory_space<vmem>>, vector<64x256xbf16>
    %c0_0 = arith.constant 0 : index
    %c0_1 = arith.constant 0 : index
    %1 = vector.load %arg2[%c0_0, %c0_1] : memref<512x64xbf16, #tpu.memory_space<vmem>>, vector<32x64xbf16>
    %cst = arith.constant dense<0.000000e+00> : vector<32x256xf32>
    %2 = tpu.matmul %1, %0, %cst {dimension_numbers = #tpu.dot_dimension_numbers<[1], [0], [0], [1], [0, 0, 1, 1], [], []>} : vector<32x64xbf16>, vector<64x256xbf16>, vector<32x256xf32> -> vector<32x256xf32>
    %c0_2 = arith.constant 0 : index
    %c118 = arith.constant 118 : index
    %3 = vector.load %arg0[%c0_2, %c118] : memref<64x512xbf16, #tpu.memory_space<vmem>>, vector<64x256xbf16>
    %c32 = arith.constant 32 : index
    %c0_3 = arith.constant 0 : index
    %4 = vector.load %arg2[%c32, %c0_3] : memref<512x64xbf16, #tpu.memory_space<vmem>>, vector<32x64xbf16>
    %cst_4 = arith.constant dense<0.000000e+00> : vector<32x256xf32>
    %5 = tpu.matmul %4, %3, %cst_4 {dimension_numbers = #tpu.dot_dimension_numbers<[1], [0], [0], [1], [0, 0, 1, 1], [], []>} : vector<32x64xbf16>, vector<64x256xbf16>, vector<32x256xf32> -> vector<32x256xf32>
    %6 = arith.addf %2, %5 : vector<32x256xf32>
    %c128 = arith.constant 128 : index
    %c0_5 = arith.constant 0 : index
    %7 = vector.load %arg2[%c128, %c0_5] : memref<512x64xbf16, #tpu.memory_space<vmem>>, vector<32x64xbf16>
    %cst_6 = arith.constant dense<0.000000e+00> : vector<32x256xf32>
    %8 = tpu.matmul %7, %3, %cst_6 {dimension_numbers = #tpu.dot_dimension_numbers<[1], [0], [0], [1], [0, 0, 1, 1], [], []>} : vector<32x64xbf16>, vector<64x256xbf16>, vector<32x256xf32> -> vector<32x256xf32>
    %c0_7 = arith.constant 0 : index
    %c119 = arith.constant 119 : index
    %9 = vector.load %arg0[%c0_7, %c119] : memref<64x512xbf16, #tpu.memory_space<vmem>>, vector<64x256xbf16>
    %c160 = arith.constant 160 : index
    %c0_8 = arith.constant 0 : index
    %10 = vector.load %arg2[%c160, %c0_8] : memref<512x64xbf16, #tpu.memory_space<vmem>>, vector<32x64xbf16>
    %cst_9 = arith.constant dense<0.000000e+00> : vector<32x256xf32>
    %11 = tpu.matmul %10, %9, %cst_9 {dimension_numbers = #tpu.dot_dimension_numbers<[1], [0], [0], [1], [0, 0, 1, 1], [], []>} : vector<32x64xbf16>, vector<64x256xbf16>, vector<32x256xf32> -> vector<32x256xf32>
    %12 = arith.addf %8, %11 : vector<32x256xf32>
    %c0_10 = arith.constant 0 : index
    %c127 = arith.constant 127 : index
    %13 = vector.load %arg0[%c0_10, %c127] : memref<64x512xbf16, #tpu.memory_space<vmem>>, vector<64x256xbf16>
    %c64 = arith.constant 64 : index
    %c0_11 = arith.constant 0 : index
    %14 = vector.load %arg2[%c64, %c0_11] : memref<512x64xbf16, #tpu.memory_space<vmem>>, vector<32x64xbf16>
    %cst_12 = arith.constant dense<0.000000e+00> : vector<32x256xf32>
    %15 = tpu.matmul %14, %13, %cst_12 {dimension_numbers = #tpu.dot_dimension_numbers<[1], [0], [0], [1], [0, 0, 1, 1], [], []>} : vector<32x64xbf16>, vector<64x256xbf16>, vector<32x256xf32> -> vector<32x256xf32>
    %16 = arith.addf %6, %15 : vector<32x256xf32>
    %c256 = arith.constant 256 : index
    %c0_13 = arith.constant 0 : index
    %17 = vector.load %arg2[%c256, %c0_13] : memref<512x64xbf16, #tpu.memory_space<vmem>>, vector<32x64xbf16>
    %cst_14 = arith.constant dense<0.000000e+00> : vector<32x256xf32>
    %18 = tpu.matmul %17, %13, %cst_14 {dimension_numbers = #tpu.dot_dimension_numbers<[1], [0], [0], [1], [0, 0, 1, 1], [], []>} : vector<32x64xbf16>, vector<64x256xbf16>, vector<32x256xf32> -> vector<32x256xf32>
    %c0_15 = arith.constant 0 : index
    %c128_16 = arith.constant 128 : index
    %19 = vector.load %arg0[%c0_15, %c128_16] : memref<64x512xbf16, #tpu.memory_space<vmem>>, vector<64x256xbf16>
    %c96 = arith.constant 96 : index
    %c0_17 = arith.constant 0 : index
    %20 = vector.load %arg2[%c96, %c0_17] : memref<512x64xbf16, #tpu.memory_space<vmem>>, vector<32x64xbf16>
    %cst_18 = arith.constant dense<0.000000e+00> : vector<32x256xf32>
    %21 = tpu.matmul %20, %19, %cst_18 {dimension_numbers = #tpu.dot_dimension_numbers<[1], [0], [0], [1], [0, 0, 1, 1], [], []>} : vector<32x64xbf16>, vector<64x256xbf16>, vector<32x256xf32> -> vector<32x256xf32>
    %22 = arith.addf %16, %21 : vector<32x256xf32>
    %c192 = arith.constant 192 : index
    %c0_19 = arith.constant 0 : index
    %23 = vector.load %arg2[%c192, %c0_19] : memref<512x64xbf16, #tpu.memory_space<vmem>>, vector<32x64xbf16>
    %cst_20 = arith.constant dense<0.000000e+00> : vector<32x256xf32>
    %24 = tpu.matmul %23, %19, %cst_20 {dimension_numbers = #tpu.dot_dimension_numbers<[1], [0], [0], [1], [0, 0, 1, 1], [], []>} : vector<32x64xbf16>, vector<64x256xbf16>, vector<32x256xf32> -> vector<32x256xf32>
    %25 = arith.addf %12, %24 : vector<32x256xf32>
    %c288 = arith.constant 288 : index
    %c0_21 = arith.constant 0 : index
    %26 = vector.load %arg2[%c288, %c0_21] : memref<512x64xbf16, #tpu.memory_space<vmem>>, vector<32x64xbf16>
    %cst_22 = arith.constant dense<0.000000e+00> : vector<32x256xf32>
    %27 = tpu.matmul %26, %19, %cst_22 {dimension_numbers = #tpu.dot_dimension_numbers<[1], [0], [0], [1], [0, 0, 1, 1], [], []>} : vector<32x64xbf16>, vector<64x256xbf16>, vector<32x256xf32> -> vector<32x256xf32>
    %28 = arith.addf %18, %27 : vector<32x256xf32>
    %c384 = arith.constant 384 : index
    %c0_23 = arith.constant 0 : index
    %29 = vector.load %arg2[%c384, %c0_23] : memref<512x64xbf16, #tpu.memory_space<vmem>>, vector<32x64xbf16>
    %cst_24 = arith.constant dense<0.000000e+00> : vector<32x256xf32>
    %30 = tpu.matmul %29, %19, %cst_24 {dimension_numbers = #tpu.dot_dimension_numbers<[1], [0], [0], [1], [0, 0, 1, 1], [], []>} : vector<32x64xbf16>, vector<64x256xbf16>, vector<32x256xf32> -> vector<32x256xf32>
    %c0_25 = arith.constant 0 : index
    %c129 = arith.constant 129 : index
    %31 = vector.load %arg0[%c0_25, %c129] : memref<64x512xbf16, #tpu.memory_space<vmem>>, vector<64x256xbf16>
    %c224 = arith.constant 224 : index
    %c0_26 = arith.constant 0 : index
    %32 = vector.load %arg2[%c224, %c0_26] : memref<512x64xbf16, #tpu.memory_space<vmem>>, vector<32x64xbf16>
    %cst_27 = arith.constant dense<0.000000e+00> : vector<32x256xf32>
    %33 = tpu.matmul %32, %31, %cst_27 {dimension_numbers = #tpu.dot_dimension_numbers<[1], [0], [0], [1], [0, 0, 1, 1], [], []>} : vector<32x64xbf16>, vector<64x256xbf16>, vector<32x256xf32> -> vector<32x256xf32>
    %34 = arith.addf %25, %33 : vector<32x256xf32>
    %c416 = arith.constant 416 : index
    %c0_28 = arith.constant 0 : index
    %35 = vector.load %arg2[%c416, %c0_28] : memref<512x64xbf16, #tpu.memory_space<vmem>>, vector<32x64xbf16>
    %cst_29 = arith.constant dense<0.000000e+00> : vector<32x256xf32>
    %36 = tpu.matmul %35, %31, %cst_29 {dimension_numbers = #tpu.dot_dimension_numbers<[1], [0], [0], [1], [0, 0, 1, 1], [], []>} : vector<32x64xbf16>, vector<64x256xbf16>, vector<32x256xf32> -> vector<32x256xf32>
    %37 = arith.addf %30, %36 : vector<32x256xf32>
    %c0_30 = arith.constant 0 : index
    %c137 = arith.constant 137 : index
    %38 = vector.load %arg0[%c0_30, %c137] : memref<64x512xbf16, #tpu.memory_space<vmem>>, vector<64x256xbf16>
    %c320 = arith.constant 320 : index
    %c0_31 = arith.constant 0 : index
    %39 = vector.load %arg2[%c320, %c0_31] : memref<512x64xbf16, #tpu.memory_space<vmem>>, vector<32x64xbf16>
    %cst_32 = arith.constant dense<0.000000e+00> : vector<32x256xf32>
    %40 = tpu.matmul %39, %38, %cst_32 {dimension_numbers = #tpu.dot_dimension_numbers<[1], [0], [0], [1], [0, 0, 1, 1], [], []>} : vector<32x64xbf16>, vector<64x256xbf16>, vector<32x256xf32> -> vector<32x256xf32>
    %41 = arith.addf %28, %40 : vector<32x256xf32>
    %c0_33 = arith.constant 0 : index
    %c138 = arith.constant 138 : index
    %42 = vector.load %arg0[%c0_33, %c138] : memref<64x512xbf16, #tpu.memory_space<vmem>>, vector<64x256xbf16>
    %c352 = arith.constant 352 : index
    %c0_34 = arith.constant 0 : index
    %43 = vector.load %arg2[%c352, %c0_34] : memref<512x64xbf16, #tpu.memory_space<vmem>>, vector<32x64xbf16>
    %cst_35 = arith.constant dense<0.000000e+00> : vector<32x256xf32>
    %44 = tpu.matmul %43, %42, %cst_35 {dimension_numbers = #tpu.dot_dimension_numbers<[1], [0], [0], [1], [0, 0, 1, 1], [], []>} : vector<32x64xbf16>, vector<64x256xbf16>, vector<32x256xf32> -> vector<32x256xf32>
    %45 = arith.addf %41, %44 : vector<32x256xf32>
    %c448 = arith.constant 448 : index
    %c0_36 = arith.constant 0 : index
    %46 = vector.load %arg2[%c448, %c0_36] : memref<512x64xbf16, #tpu.memory_space<vmem>>, vector<32x64xbf16>
    %cst_37 = arith.constant dense<0.000000e+00> : vector<32x256xf32>
    %47 = tpu.matmul %46, %42, %cst_37 {dimension_numbers = #tpu.dot_dimension_numbers<[1], [0], [0], [1], [0, 0, 1, 1], [], []>} : vector<32x64xbf16>, vector<64x256xbf16>, vector<32x256xf32> -> vector<32x256xf32>
    %48 = arith.addf %37, %47 : vector<32x256xf32>
    %c0_38 = arith.constant 0 : index
    %c139 = arith.constant 139 : index
    %49 = vector.load %arg0[%c0_38, %c139] : memref<64x512xbf16, #tpu.memory_space<vmem>>, vector<64x256xbf16>
    %c480 = arith.constant 480 : index
    %c0_39 = arith.constant 0 : index
    %50 = vector.load %arg2[%c480, %c0_39] : memref<512x64xbf16, #tpu.memory_space<vmem>>, vector<32x64xbf16>
    %cst_40 = arith.constant dense<0.000000e+00> : vector<32x256xf32>
    %51 = tpu.matmul %50, %49, %cst_40 {dimension_numbers = #tpu.dot_dimension_numbers<[1], [0], [0], [1], [0, 0, 1, 1], [], []>} : vector<32x64xbf16>, vector<64x256xbf16>, vector<32x256xf32> -> vector<32x256xf32>
    %52 = arith.addf %48, %51 : vector<32x256xf32>
    %c0_41 = arith.constant 0 : index
    %c0_42 = arith.constant 0 : index
    %53 = vector.load %arg1[%c0_41, %c0_42] : memref<256x1xf32, #tpu.memory_space<vmem>>, vector<256x1xf32>
    %54 = vector.shape_cast %53 : vector<256x1xf32> to vector<256x1xf32>
    %55 = vector.broadcast %54 : vector<256x1xf32> to vector<256x128xf32>
    %cst_43 = arith.constant 0.000000e+00 : f32
    %56 = vector.broadcast %cst_43 : f32 to vector<32x128xf32>
    %cst_44 = arith.constant 0.000000e+00 : f32
    %57 = vector.broadcast %cst_44 : f32 to vector<32x128xf32>
    %cst_45 = arith.constant dense<0.000000e+00> : vector<32x128xf32>
    %58 = tpu.matmul %22, %55, %cst_45 {dimension_numbers = #tpu.dot_dimension_numbers<[1], [0], [0], [1], [0, 0, 1, 1], [], []>} : vector<32x256xf32>, vector<256x128xf32>, vector<32x128xf32> -> vector<32x128xf32>
    %59 = arith.addf %56, %58 : vector<32x128xf32>
    %60 = arith.mulf %22, %22 : vector<32x256xf32>
    %cst_46 = arith.constant dense<0.000000e+00> : vector<32x128xf32>
    %61 = tpu.matmul %60, %55, %cst_46 {dimension_numbers = #tpu.dot_dimension_numbers<[1], [0], [0], [1], [0, 0, 1, 1], [], []>} : vector<32x256xf32>, vector<256x128xf32>, vector<32x128xf32> -> vector<32x128xf32>
    %62 = arith.addf %57, %61 : vector<32x128xf32>
    %cst_47 = arith.constant dense<0.000000e+00> : vector<32x128xf32>
    %63 = tpu.matmul %34, %55, %cst_47 {dimension_numbers = #tpu.dot_dimension_numbers<[1], [0], [0], [1], [0, 0, 1, 1], [], []>} : vector<32x256xf32>, vector<256x128xf32>, vector<32x128xf32> -> vector<32x128xf32>
    %64 = arith.addf %59, %63 : vector<32x128xf32>
    %65 = arith.mulf %34, %34 : vector<32x256xf32>
    %cst_48 = arith.constant dense<0.000000e+00> : vector<32x128xf32>
    %66 = tpu.matmul %65, %55, %cst_48 {dimension_numbers = #tpu.dot_dimension_numbers<[1], [0], [0], [1], [0, 0, 1, 1], [], []>} : vector<32x256xf32>, vector<256x128xf32>, vector<32x128xf32> -> vector<32x128xf32>
    %67 = arith.addf %62, %66 : vector<32x128xf32>
    %cst_49 = arith.constant dense<0.000000e+00> : vector<32x128xf32>
    %68 = tpu.matmul %45, %55, %cst_49 {dimension_numbers = #tpu.dot_dimension_numbers<[1], [0], [0], [1], [0, 0, 1, 1], [], []>} : vector<32x256xf32>, vector<256x128xf32>, vector<32x128xf32> -> vector<32x128xf32>
    %69 = arith.addf %64, %68 : vector<32x128xf32>
    %70 = arith.mulf %45, %45 : vector<32x256xf32>
    %cst_50 = arith.constant dense<0.000000e+00> : vector<32x128xf32>
    %71 = tpu.matmul %70, %55, %cst_50 {dimension_numbers = #tpu.dot_dimension_numbers<[1], [0], [0], [1], [0, 0, 1, 1], [], []>} : vector<32x256xf32>, vector<256x128xf32>, vector<32x128xf32> -> vector<32x128xf32>
    %72 = arith.addf %67, %71 : vector<32x128xf32>
    %cst_51 = arith.constant dense<0.000000e+00> : vector<32x128xf32>
    %73 = tpu.matmul %52, %55, %cst_51 {dimension_numbers = #tpu.dot_dimension_numbers<[1], [0], [0], [1], [0, 0, 1, 1], [], []>} : vector<32x256xf32>, vector<256x128xf32>, vector<32x128xf32> -> vector<32x128xf32>
    %74 = arith.addf %69, %73 : vector<32x128xf32>
    %75 = arith.mulf %52, %52 : vector<32x256xf32>
    %cst_52 = arith.constant dense<0.000000e+00> : vector<32x128xf32>
    %76 = tpu.matmul %75, %55, %cst_52 {dimension_numbers = #tpu.dot_dimension_numbers<[1], [0], [0], [1], [0, 0, 1, 1], [], []>} : vector<32x256xf32>, vector<256x128xf32>, vector<32x128xf32> -> vector<32x128xf32>
    %77 = arith.addf %72, %76 : vector<32x128xf32>
    %78 = vector.extract_strided_slice %74 {offsets = [0, 0], sizes = [32, 1], strides = [1, 1]} : vector<32x128xf32> to vector<32x1xf32>
    %cst_53 = arith.constant 0.001953125 : f32
    %79 = vector.broadcast %cst_53 : f32 to vector<32x1xf32>
    %80 = arith.mulf %78, %79 : vector<32x1xf32>
    %81 = vector.extract_strided_slice %77 {offsets = [0, 0], sizes = [32, 1], strides = [1, 1]} : vector<32x128xf32> to vector<32x1xf32>
    %cst_54 = arith.constant 0.001953125 : f32
    %82 = vector.broadcast %cst_54 : f32 to vector<32x1xf32>
    %83 = arith.mulf %81, %82 : vector<32x1xf32>
    %84 = arith.mulf %80, %80 : vector<32x1xf32>
    %85 = arith.subf %83, %84 : vector<32x1xf32>
    %cst_55 = arith.constant 0.000000e+00 : f32
    %86 = vector.broadcast %cst_55 : f32 to vector<32x1xf32>
    %87 = arith.maximumf %85, %86 : vector<32x1xf32>
    %c0_56 = arith.constant 0 : index
    %c0_57 = arith.constant 0 : index
    %88 = vector.load %arg3[%c0_56, %c0_57] : memref<32x1xf32, #tpu.memory_space<vmem>>, vector<32x1xf32>
    %cst_58 = arith.constant 9.99999974E-6 : f32
    %89 = vector.broadcast %cst_58 : f32 to vector<32x1xf32>
    %90 = arith.addf %87, %89 : vector<32x1xf32>
    %91 = math.rsqrt %90 : vector<32x1xf32>
    %92 = arith.mulf %88, %91 : vector<32x1xf32>
    %c0_59 = arith.constant 0 : index
    %c0_60 = arith.constant 0 : index
    %93 = vector.load %arg4[%c0_59, %c0_60] : memref<32x1xf32, #tpu.memory_space<vmem>>, vector<32x1xf32>
    %94 = arith.mulf %80, %92 : vector<32x1xf32>
    %95 = arith.subf %93, %94 : vector<32x1xf32>
    %c0_61 = arith.constant 0 : index
    %c0_62 = arith.constant 0 : index
    %96 = vector.load %arg5[%c0_61, %c0_62] : memref<8x32xbf16, #tpu.memory_space<vmem>>, vector<8x32xbf16>
    %c0_63 = arith.constant 0 : index
    %c0_64 = arith.constant 0 : index
    %97 = vector.load %arg6[%c0_63, %c0_64] : memref<8x1xf32, #tpu.memory_space<vmem>>, vector<8x1xf32>
    %98 = vector.broadcast %92 : vector<32x1xf32> to vector<32x256xf32>
    %99 = arith.mulf %22, %98 : vector<32x256xf32>
    %100 = vector.broadcast %95 : vector<32x1xf32> to vector<32x256xf32>
    %101 = arith.addf %99, %100 : vector<32x256xf32>
    %cst_65 = arith.constant 0.000000e+00 : f32
    %102 = vector.broadcast %cst_65 : f32 to vector<32x256xf32>
    %103 = arith.maximumf %101, %102 : vector<32x256xf32>
    %104 = arith.truncf %103 : vector<32x256xf32> to vector<32x256xbf16>
    %cst_66 = arith.constant dense<0.000000e+00> : vector<8x256xf32>
    %105 = tpu.matmul %96, %104, %cst_66 {dimension_numbers = #tpu.dot_dimension_numbers<[1], [0], [0], [1], [0, 0, 1, 1], [], []>} : vector<8x32xbf16>, vector<32x256xbf16>, vector<8x256xf32> -> vector<8x256xf32>
    %106 = vector.broadcast %97 : vector<8x1xf32> to vector<8x256xf32>
    %107 = arith.addf %105, %106 : vector<8x256xf32>
    %c0_67 = arith.constant 0 : index
    %c0_68 = arith.constant 0 : index
    %c0_69 = arith.constant 0 : index
    %108 = vector.load %arg7[%c0_67, %c0_68, %c0_69] : memref<4x8x256xf32, #tpu.memory_space<vmem>>, vector<1x8x256xf32>
    %109 = vector.shape_cast %108 : vector<1x8x256xf32> to vector<8x256xf32>
    %110 = vector.shape_cast %107 : vector<8x256xf32> to vector<1x8x256xf32>
    tpu.vector_store %arg7[%c0_67, %c0_68, %c0_69], %110 {strides = array<i32>} : memref<4x8x256xf32, #tpu.memory_space<vmem>>, vector<1x8x256xf32>,
    %111 = vector.broadcast %92 : vector<32x1xf32> to vector<32x256xf32>
    %112 = arith.mulf %34, %111 : vector<32x256xf32>
    %113 = vector.broadcast %95 : vector<32x1xf32> to vector<32x256xf32>
    %114 = arith.addf %112, %113 : vector<32x256xf32>
    %cst_70 = arith.constant 0.000000e+00 : f32
    %115 = vector.broadcast %cst_70 : f32 to vector<32x256xf32>
    %116 = arith.maximumf %114, %115 : vector<32x256xf32>
    %117 = arith.truncf %116 : vector<32x256xf32> to vector<32x256xbf16>
    %cst_71 = arith.constant dense<0.000000e+00> : vector<8x256xf32>
    %118 = tpu.matmul %96, %117, %cst_71 {dimension_numbers = #tpu.dot_dimension_numbers<[1], [0], [0], [1], [0, 0, 1, 1], [], []>} : vector<8x32xbf16>, vector<32x256xbf16>, vector<8x256xf32> -> vector<8x256xf32>
    %119 = vector.broadcast %97 : vector<8x1xf32> to vector<8x256xf32>
    %120 = arith.addf %118, %119 : vector<8x256xf32>
    %c1 = arith.constant 1 : index
    %c0_72 = arith.constant 0 : index
    %c0_73 = arith.constant 0 : index
    %121 = vector.load %arg7[%c1, %c0_72, %c0_73] : memref<4x8x256xf32, #tpu.memory_space<vmem>>, vector<1x8x256xf32>
    %122 = vector.shape_cast %121 : vector<1x8x256xf32> to vector<8x256xf32>
    %123 = vector.shape_cast %120 : vector<8x256xf32> to vector<1x8x256xf32>
    tpu.vector_store %arg7[%c1, %c0_72, %c0_73], %123 {strides = array<i32>} : memref<4x8x256xf32, #tpu.memory_space<vmem>>, vector<1x8x256xf32>,
    %124 = vector.broadcast %92 : vector<32x1xf32> to vector<32x256xf32>
    %125 = arith.mulf %45, %124 : vector<32x256xf32>
    %126 = vector.broadcast %95 : vector<32x1xf32> to vector<32x256xf32>
    %127 = arith.addf %125, %126 : vector<32x256xf32>
    %cst_74 = arith.constant 0.000000e+00 : f32
    %128 = vector.broadcast %cst_74 : f32 to vector<32x256xf32>
    %129 = arith.maximumf %127, %128 : vector<32x256xf32>
    %130 = arith.truncf %129 : vector<32x256xf32> to vector<32x256xbf16>
    %cst_75 = arith.constant dense<0.000000e+00> : vector<8x256xf32>
    %131 = tpu.matmul %96, %130, %cst_75 {dimension_numbers = #tpu.dot_dimension_numbers<[1], [0], [0], [1], [0, 0, 1, 1], [], []>} : vector<8x32xbf16>, vector<32x256xbf16>, vector<8x256xf32> -> vector<8x256xf32>
    %132 = vector.broadcast %97 : vector<8x1xf32> to vector<8x256xf32>
    %133 = arith.addf %131, %132 : vector<8x256xf32>
    %c2 = arith.constant 2 : index
    %c0_76 = arith.constant 0 : index
    %c0_77 = arith.constant 0 : index
    %134 = vector.load %arg7[%c2, %c0_76, %c0_77] : memref<4x8x256xf32, #tpu.memory_space<vmem>>, vector<1x8x256xf32>
    %135 = vector.shape_cast %134 : vector<1x8x256xf32> to vector<8x256xf32>
    %136 = vector.shape_cast %133 : vector<8x256xf32> to vector<1x8x256xf32>
    tpu.vector_store %arg7[%c2, %c0_76, %c0_77], %136 {strides = array<i32>} : memref<4x8x256xf32, #tpu.memory_space<vmem>>, vector<1x8x256xf32>,
    %137 = vector.broadcast %92 : vector<32x1xf32> to vector<32x256xf32>
    %138 = arith.mulf %52, %137 : vector<32x256xf32>
    %139 = vector.broadcast %95 : vector<32x1xf32> to vector<32x256xf32>
    %140 = arith.addf %138, %139 : vector<32x256xf32>
    %cst_78 = arith.constant 0.000000e+00 : f32
    %141 = vector.broadcast %cst_78 : f32 to vector<32x256xf32>
    %142 = arith.maximumf %140, %141 : vector<32x256xf32>
    %143 = arith.truncf %142 : vector<32x256xf32> to vector<32x256xbf16>
    %cst_79 = arith.constant dense<0.000000e+00> : vector<8x256xf32>
    %144 = tpu.matmul %96, %143, %cst_79 {dimension_numbers = #tpu.dot_dimension_numbers<[1], [0], [0], [1], [0, 0, 1, 1], [], []>} : vector<8x32xbf16>, vector<32x256xbf16>, vector<8x256xf32> -> vector<8x256xf32>
    %145 = vector.broadcast %97 : vector<8x1xf32> to vector<8x256xf32>
    %146 = arith.addf %144, %145 : vector<8x256xf32>
    %c3 = arith.constant 3 : index
    %c0_80 = arith.constant 0 : index
    %c0_81 = arith.constant 0 : index
    %147 = vector.load %arg7[%c3, %c0_80, %c0_81] : memref<4x8x256xf32, #tpu.memory_space<vmem>>, vector<1x8x256xf32>
    %148 = vector.shape_cast %147 : vector<1x8x256xf32> to vector<8x256xf32>
    %149 = vector.shape_cast %146 : vector<8x256xf32> to vector<1x8x256xf32>
    tpu.vector_store %arg7[%c3, %c0_80, %c0_81], %149 {strides = array<i32>} : memref<4x8x256xf32, #tpu.memory_space<vmem>>, vector<1x8x256xf32>,
    return
  }
}

</mosaic_0001>

<bundles_post_ra>
// kernel: tpu_custom_call.1
= control target key start
LH: loop header
LB: loop body
LE: loop exit
PB: predicated region body
PF: predicated region fallthrough
CT: control target
= control target key end

     0   :  { %s3655_s28 = smov 11   ;;  %v5205_v12 = vmov 0   ;;  %s3657_s26 = smov 10   ;;  %s5197_s0 = inlined_call_operand.vmem [shape: bf16[64,512], index: 0, kind: input, shape index: {}]   ;;  %s5198_s1 = inlined_call_operand.vmem [shape: f32[256,1], index: 1, kind: input, shape index: {}]   ;;  %s5199_s2 = inlined_call_operand.vmem [shape: bf16[512,64], index: 2, kind: input, shape index: {}]   ;;  %s5200_s3 = inlined_call_operand.vmem [shape: f32[32,1], index: 3, kind: input, shape index: {}]   ;;  %s5201_s4 = inlined_call_operand.vmem [shape: f32[32,1], index: 4, kind: input, shape index: {}]   ;;  %s5202_s5 = inlined_call_operand.vmem [shape: bf16[8,32], index: 5, kind: input, shape index: {}]   ;;  %s5203_s6 = inlined_call_operand.vmem [shape: f32[8,1], index: 6, kind: input, shape index: {}]   ;;  %s5204_s7 = inlined_call_operand.hbm [shape: f32[4,8,256], index: 7, kind: output, shape index: {}]  }
   0x1   :  { %v3561_v0 = vld [vmem:[%s5197_s0 + $0x64] ss:$16 sps:$4 sm:$0xff]   ;;  %v3563_v1 = vld [vmem:[%s5197_s0 + $0x60] ss:$16 sps:$4 sm:$0xff]   ;;  %v3564_v2 = vld [vmem:[%s5197_s0 + $0x68] ss:$16 sps:$4 sm:$0xff]   ;;  %304 = vmatprep.mubr.bf16.mxu1 %v5205_v12  ;;  %194 = vmatprep.mubr.bf16.mxu0 %v5205_v12 }
   0x2   :  { %245 = vrot.lane.b32.xlu0 %v3561_v0, %s3655_s28  ;;  %243 = vrot.lane.b32.xlu1 %v3563_v1, %s3655_s28  ;;  %v3565_v3 = vld [vmem:[%s5197_s0 + $0x44] ss:$16 sps:$4 sm:$0xff]   ;;  %v3567_v4 = vld [vmem:[%s5197_s0 + $0x48] ss:$16 sps:$4 sm:$0xff]  }
   0x3   :  { %v3568_v5 = vld [vmem:[%s5197_s0 + $0x40] ss:$16 sps:$4 sm:$0xff]   ;;  %v3570_v6 = vld [vmem:[%s5197_s0 + $0x24] ss:$16 sps:$4 sm:$0xff]   ;;  %v3569_v7 = vld [vmem:[%s5197_s0 + $0x28] ss:$16 sps:$4 sm:$0xff]   ;;  %3560 = vset.pattern.permute.xlu1 %v5205_v12  ;;  %3559 = vset.pattern.permute.xlu0 %v5205_v12 }
   0x4   :  { %v3572_v8 = vld [vmem:[%s5197_s0 + $0x20] ss:$16 sps:$4 sm:$0xff]   ;;  %v3573_v9 = vld [vmem:[%s5197_s0 + $0x4] ss:$16 sps:$4 sm:$0xff]   ;;  %v3575_v10 = vld [vmem:[%s5197_s0 + $0x8] ss:$16 sps:$4 sm:$0xff]  }
   0x5   :  { %v3576_v11 = vld [vmem:[%s5197_s0] ss:$16 sps:$4 sm:$0xff]  }
   0x6   :  { %247 = vrot.lane.b32.xlu0 %v3564_v2, %s3655_s28  ;;  %239 = vrot.lane.b32.xlu1 %v3565_v3, %s3655_s28 }
   0xa   :  { %241 = vrot.lane.b32.xlu0 %v3567_v4, %s3655_s28  ;;  %237 = vrot.lane.b32.xlu1 %v3568_v5, %s3655_s28 }
   0xe   :  { %233 = vrot.lane.b32.xlu0 %v3570_v6, %s3655_s28  ;;  %235 = vrot.lane.b32.xlu1 %v3569_v7, %s3655_s28 }
  0x12   :  { %231 = vrot.lane.b32.xlu0 %v3572_v8, %s3655_s28  ;;  %227 = vrot.lane.b32.xlu1 %v3573_v9, %s3655_s28 }
  0x16   :  { %229 = vrot.lane.b32.xlu0 %v3575_v10, %s3655_s28  ;;  %225 = vrot.lane.b32.xlu1 %v3576_v11, %s3655_s28 }
  0x1a   :  { %134 = vrot.lane.b32.xlu0 %v3561_v0, %s3657_s26  ;;  %136 = vrot.lane.b32.xlu1 %v3564_v2, %s3657_s26 }
  0x1e   :  { %132 = vrot.lane.b32.xlu0 %v3563_v1, %s3657_s26  ;;  %128 = vrot.lane.b32.xlu1 %v3565_v3, %s3657_s26 }
  0x22   :  { %130 = vrot.lane.b32.xlu0 %v3567_v4, %s3657_s26  ;;  %126 = vrot.lane.b32.xlu1 %v3568_v5, %s3657_s26 }
  0x26   :  { %122 = vrot.lane.b32.xlu0 %v3570_v6, %s3657_s26  ;;  %124 = vrot.lane.b32.xlu1 %v3569_v7, %s3657_s26 }
  0x27   :  { %12 = vsyncpa [#allocation3], 0  ;;  %s3658_s27 = smov 9   ;;  %s3659_s28 = smov 1   ;;  %v3750_v13 = vld [vmem:[%s5197_s0 + $0x68] ss:$16 sps:$4 sm:$0xff]  }
  0x28   :  { %v3755_v14 = vld [vmem:[%s5197_s0 + $0x6c] ss:$16 sps:$4 sm:$0xff]   ;;  %s3660_s10 = smov 127   ;;  %v3761_v15 = vld [vmem:[%s5197_s0 + $0x64] ss:$16 sps:$4 sm:$0xff]   ;;  %vm249_vm0 = vcmask 89088  }
  0x29   :  { %v3767_v16 = vld [vmem:[%s5197_s0 + $0x48] ss:$16 sps:$4 sm:$0xff]   ;;  %v3773_v17 = vld [vmem:[%s5197_s0 + $0x4c] ss:$16 sps:$4 sm:$0xff]   ;;  %v3779_v18 = vld [vmem:[%s5197_s0 + $0x44] ss:$16 sps:$4 sm:$0xff]  }
  0x2a   :  { %120 = vrot.lane.b32.xlu0 %v3572_v8, %s3657_s26  ;;  %116 = vrot.lane.b32.xlu1 %v3573_v9, %s3657_s26  ;;  %v3785_v19 = vld [vmem:[%s5197_s0 + $0x28] ss:$16 sps:$4 sm:$0xff]   ;;  %v3791_v20 = vld [vmem:[%s5197_s0 + $0x2c] ss:$16 sps:$4 sm:$0xff]   ;;  %s3661_s8 = smov 119   ;;  %vm138_vm1 = vcmask 80896  }
  0x2b   :  { %v3797_v21 = vld [vmem:[%s5197_s0 + $0x24] ss:$16 sps:$4 sm:$0xff]   ;;  %v3803_v22 = vld [vmem:[%s5197_s0 + $0x8] ss:$16 sps:$4 sm:$0xff]   ;;  %v3809_v23 = vld [vmem:[%s5197_s0 + $0xc] ss:$16 sps:$4 sm:$0xff]  }
  0x2c   :  { %v3815_v24 = vld [vmem:[%s5197_s0 + $0x4] ss:$16 sps:$4 sm:$0xff]   ;;  %s3662_s0 = smov 118   ;;  %vm155_vm2 = vcmask 523264   ;;  %v3596_v55 = vld [vmem:[%s5199_s2 + $0x8] sm:$0xff]   ;;  %vm367_vm3 = vcmask 72704  }
  0x2d   :  { %v3593_v45 = vld [vmem:[%s5199_s2] sm:$0xff]   ;;  %s3663_s17 = smov 117   ;;  %vm550_vm4 = vcmask 7168   ;;  %vm1100_vm5 = vcmask 1039360   ;;  %vm1486_vm6 = vcmask 965632   ;;  %vm1364_vm7 = vcmask 973824  }
  0x2e   :  { %118 = vrot.lane.b32.xlu0 %v3575_v10, %s3657_s26  ;;  %114 = vrot.lane.b32.xlu1 %v3576_v11, %s3657_s26  ;;  %vm1689_vm8 = vcmask 957440   ;;  %vm2816_vm9 = vcmask 261120  }
  0x32   :  { %363 = vrot.lane.b32.xlu0 %v3561_v0, %s3658_s27  ;;  %365 = vrot.lane.b32.xlu1 %v3564_v2, %s3658_s27 }
  0x36   :  { %361 = vrot.lane.b32.xlu0 %v3563_v1, %s3658_s27  ;;  %357 = vrot.lane.b32.xlu1 %v3565_v3, %s3658_s27 }
  0x3a   :  { %359 = vrot.lane.b32.xlu0 %v3567_v4, %s3658_s27  ;;  %355 = vrot.lane.b32.xlu1 %v3568_v5, %s3658_s27 }
  0x3e   :  { %351 = vrot.lane.b32.xlu0 %v3570_v6, %s3658_s27  ;;  %353 = vrot.lane.b32.xlu1 %v3569_v7, %s3658_s27 }
  0x42   :  { %349 = vrot.lane.b32.xlu0 %v3572_v8, %s3658_s27  ;;  %345 = vrot.lane.b32.xlu1 %v3573_v9, %s3658_s27 }
  0x46   :  { %347 = vrot.lane.b32.xlu0 %v3575_v10, %s3658_s27  ;;  %343 = vrot.lane.b32.xlu1 %v3576_v11, %s3658_s27 }
  0x4a   :  { %546 = vrot.lane.b32.xlu0 %v3561_v0, %s3659_s28  ;;  %548 = vrot.lane.b32.xlu1 %v3564_v2, %s3659_s28 }
  0x4e   :  { %544 = vrot.lane.b32.xlu0 %v3563_v1, %s3659_s28  ;;  %540 = vrot.lane.b32.xlu1 %v3565_v3, %s3659_s28 }
  0x52   :  { %542 = vrot.lane.b32.xlu0 %v3567_v4, %s3659_s28  ;;  %538 = vrot.lane.b32.xlu1 %v3568_v5, %s3659_s28  ;;  %v3594_v4 = vld [vmem:[%s5199_s2 + $0x10] sm:$0xff]   ;;  %v3597_v5 = vld [vmem:[%s5199_s2 + $0x40] sm:$0xff]  }
  0x56   :  { %534 = vrot.lane.b32.xlu0 %v3570_v6, %s3659_s28  ;;  %536 = vrot.lane.b32.xlu1 %v3569_v7, %s3659_s28 }
  0x5a   :  { %532 = vrot.lane.b32.xlu0 %v3572_v8, %s3659_s28  ;;  %528 = vrot.lane.b32.xlu1 %v3573_v9, %s3659_s28 }
  0x5e   :  { %530 = vrot.lane.b32.xlu0 %v3575_v10, %s3659_s28  ;;  %526 = vrot.lane.b32.xlu1 %v3576_v11, %s3659_s28 }
  0x62   :  { %1096 = vrot.lane.b32.xlu0 %v3750_v13, %s3660_s10  ;;  %1098 = vrot.lane.b32.xlu1 %v3755_v14, %s3660_s10 }
  0x66   :  { %1094 = vrot.lane.b32.xlu0 %v3761_v15, %s3660_s10  ;;  %1090 = vrot.lane.b32.xlu1 %v3767_v16, %s3660_s10 }
  0x6a   :  { %1092 = vrot.lane.b32.xlu0 %v3773_v17, %s3660_s10  ;;  %1088 = vrot.lane.b32.xlu1 %v3779_v18, %s3660_s10 }
  0x6e   :  { %1084 = vrot.lane.b32.xlu0 %v3785_v19, %s3660_s10  ;;  %1086 = vrot.lane.b32.xlu1 %v3791_v20, %s3660_s10 }
  0x72   :  { %1082 = vrot.lane.b32.xlu0 %v3797_v21, %s3660_s10  ;;  %1078 = vrot.lane.b32.xlu1 %v3803_v22, %s3660_s10 }
  0x74   :  { %v246_v25 = vpop.permute.xlu0 %245  ;;  %v244_v26 = vpop.permute.xlu1 %243 }
  0x75   :  { %v256_v30 = vsel %vm249_vm0, %v244_v26, %v246_v25  ;;  %v3599_v26 = vld [vmem:[%s5199_s2 + $0x48] sm:$0xff]  }
  0x76   :  { %1080 = vrot.lane.b32.xlu0 %v3809_v23, %s3660_s10  ;;  %1076 = vrot.lane.b32.xlu1 %v3815_v24, %s3660_s10 }
  0x78   :  { %v248_v27 = vpop.permute.xlu0 %247  ;;  %v240_v28 = vpop.permute.xlu1 %239 }
  0x79   :  { %v257_v29 = vsel %vm249_vm0, %v246_v25, %v248_v27  ;;  %v3595_v25 = vld [vmem:[%s5199_s2 + $0x18] sm:$0xff]  }
  0x7a   :  { %280 = vmatprep.subr.bf16.mxu1 %v257_v29  ;;  %1360 = vrot.lane.b32.xlu0 %v3750_v13, %s3661_s8 }
  0x7b   :  { %1362 = vrot.lane.b32.xlu1 %v3755_v14, %s3661_s8  ;;  %281 = vmatpush1.bf16.msra.mxu1 %v256_v30 }
  0x7c   :  { %v242_v31 = vpop.permute.xlu0 %241  ;;  %v238_v32 = vpop.permute.xlu1 %237 }
  0x7d   :  { %v255_v33 = vsel %vm249_vm0, %v240_v28, %v242_v31  ;;  %v254_v34 = vsel %vm249_vm0, %v238_v32, %v240_v28 }
  0x7e   :  { %282 = vmatprep.subr.bf16.mxu1 %v255_v33  ;;  %1358 = vrot.lane.b32.xlu0 %v3761_v15, %s3661_s8 }
  0x7f   :  { %1482 = vrot.lane.b32.xlu1 %v3750_v13, %s3662_s0  ;;  %283 = vmatpush1.bf16.msra.mxu1 %v254_v34 }
  0x80   :  { %v234_v35 = vpop.permute.xlu0 %233  ;;  %v236_v36 = vpop.permute.xlu1 %235 }
  0x81   :  { %v253_v37 = vsel %vm249_vm0, %v234_v35, %v236_v36 }
  0x82   :  { %1484 = vrot.lane.b32.xlu0 %v3755_v14, %s3662_s0  ;;  %284 = vmatprep.subr.bf16.mxu1 %v253_v37 }
  0x83   :  { %1480 = vrot.lane.b32.xlu1 %v3761_v15, %s3662_s0 }
  0x84   :  { %v232_v38 = vpop.permute.xlu0 %231  ;;  %v228_v39 = vpop.permute.xlu1 %227 }
  0x85   :  { %v252_v40 = vsel %vm249_vm0, %v232_v38, %v234_v35  ;;  %v3601_v35 = vld [vmem:[%s5199_s2 + $0x30] sm:$0xff]  }
  0x86   :  { %285 = vmatpush1.bf16.msra.mxu1 %v252_v40  ;;  %1354 = vrot.lane.b32.xlu0 %v3767_v16, %s3661_s8 }
  0x87   :  { %1356 = vrot.lane.b32.xlu1 %v3773_v17, %s3661_s8 }
  0x88   :  { %v230_v41 = vpop.permute.xlu0 %229  ;;  %v226_v42 = vpop.permute.xlu1 %225 }
  0x89   :  { %v251_v43 = vsel %vm249_vm0, %v228_v39, %v230_v41  ;;  %v250_v44 = vsel %vm249_vm0, %v226_v42, %v228_v39  ;;  %v1804_v42 = vld [vmem:[%s5198_s1 + $0xf8] sm:$0xff] }
  0x8a   :  { %1352 = vrot.lane.b32.xlu0 %v3779_v18, %s3661_s8  ;;  %286 = vmatprep.subr.bf16.mxu1 %v251_v43 }
  0x8b   :  { %1476 = vrot.lane.b32.xlu1 %v3767_v16, %s3662_s0  ;;  %287 = vmatpush1.bf16.msra.mxu1 %v250_v44  ;;  %v1788_v44 = vld [vmem:[%s5198_s1 + $0x78] sm:$0xff] }
  0x8c   :  { %v135_v46 = vpop.permute.xlu0 %134  ;;  %v137_v47 = vpop.permute.xlu1 %136 }
  0x8d   :  { %v146_v48 = vsel %vm138_vm1, %v135_v46, %v137_v47  ;;  %v3600_v47 = vld [vmem:[%s5199_s2 + $0x58] sm:$0xff]  }
  0x8e   :  { %1478 = vrot.lane.b32.xlu0 %v3773_v17, %s3662_s0  ;;  %3113 = vmatmul.mubr.msk.bf16.vlgmr.msra.gmra.mxu1 %vm155_vm2, %v3593_v45 }
  0x8f   :  { %1474 = vrot.lane.b32.xlu1 %v3779_v18, %s3662_s0  ;;  %170 = vmatprep.subr.bf16.mxu0 %v146_v48 }
  0x90   :  { %467 = vmatprep.subr.bf16.mxu1 %v146_v48  ;;  %v133_v49 = vpop.permute.xlu0 %132  ;;  %314 = vmatprep.mubr.bf16.mxu1 %v5205_v12  ;;  %v129_v50 = vpop.permute.xlu1 %128  ;;  %v1787_v48 = vld [vmem:[%s5198_s1 + $0x70] sm:$0xff] }
  0x91   :  { %v145_v51 = vsel %vm138_vm1, %v133_v49, %v135_v46 }
  0x92   :  { %1348 = vrot.lane.b32.xlu0 %v3785_v19, %s3661_s8  ;;  %171 = vmatpush1.bf16.msra.mxu0 %v145_v51 }
  0x93   :  { %1350 = vrot.lane.b32.xlu1 %v3791_v20, %s3661_s8  ;;  %468 = vmatpush1.bf16.msra.mxu1 %v145_v51 }
  0x94   :  { %v131_v52 = vpop.permute.xlu0 %130  ;;  %v127_v53 = vpop.permute.xlu1 %126 }
  0x95   :  { %v144_v54 = vsel %vm138_vm1, %v129_v50, %v131_v52  ;;  %v143_v56 = vsel %vm138_vm1, %v127_v53, %v129_v50  ;;  %v1803_v50 = vld [vmem:[%s5198_s1 + $0xf0] sm:$0xff] }
  0x96   :  { %1346 = vrot.lane.b32.xlu0 %v3797_v21, %s3661_s8  ;;  %172 = vmatprep.subr.bf16.mxu0 %v144_v54 }
  0x97   :  { %1470 = vrot.lane.b32.xlu1 %v3785_v19, %s3662_s0  ;;  %469 = vmatprep.subr.bf16.mxu1 %v144_v54  ;;  %v1786_v54 = vld [vmem:[%s5198_s1 + $0x68] sm:$0xff] }
  0x98   :  { %173 = vmatpush1.bf16.msra.mxu0 %v143_v56  ;;  %470 = vmatpush1.bf16.msra.mxu1 %v143_v56  ;;  %v123_v57 = vpop.permute.xlu0 %122  ;;  %v125_v58 = vpop.permute.xlu1 %124  ;;  %v1802_v56 = vld [vmem:[%s5198_s1 + $0xe8] sm:$0xff] }
  0x99   :  { %3114 = vmatmul.mubr.msk.bf16.gmra.mxu1 %vm155_vm2, %v3596_v55  ;;  %v142_v59 = vsel %vm138_vm1, %v123_v57, %v125_v58 }
  0x9a   :  { %1472 = vrot.lane.b32.xlu0 %v3791_v20, %s3662_s0  ;;  %491 = vmatprep.mubr.bf16.mxu1 %v5205_v12 }
  0x9b   :  { %1468 = vrot.lane.b32.xlu1 %v3797_v21, %s3662_s0  ;;  %174 = vmatprep.subr.bf16.mxu0 %v142_v59 }
  0x9c   :  { %471 = vmatprep.subr.bf16.mxu1 %v142_v59  ;;  %v121_v60 = vpop.permute.xlu0 %120  ;;  %v117_v61 = vpop.permute.xlu1 %116 }
  0x9d   :  { %v141_v62 = vsel %vm138_vm1, %v121_v60, %v123_v57  ;;  %v3604_v57 = vld [vmem:[%s5199_s2 + $0x90] sm:$0xff]   ;;  %v1785_v60 = vld [vmem:[%s5198_s1 + $0x60] sm:$0xff] }
  0x9e   :  { %1342 = vrot.lane.b32.xlu0 %v3803_v22, %s3661_s8  ;;  %175 = vmatpush1.bf16.msra.mxu0 %v141_v62 }
  0x9f   :  { %1344 = vrot.lane.b32.xlu1 %v3809_v23, %s3661_s8  ;;  %472 = vmatpush1.bf16.msra.mxu1 %v141_v62  ;;  %v1801_v62 = vld [vmem:[%s5198_s1 + $0xe0] sm:$0xff] }
  0xa0   :  { %v119_v63 = vpop.permute.xlu0 %118  ;;  %v115_v0 = vpop.permute.xlu1 %114 }
  0xa1   :  { %v140_v1 = vsel %vm138_vm1, %v117_v61, %v119_v63  ;;  %v139_v2 = vsel %vm138_vm1, %v115_v0, %v117_v61 }
  0xa2   :  { %1340 = vrot.lane.b32.xlu0 %v3815_v24, %s3661_s8  ;;  %176 = vmatprep.subr.bf16.mxu0 %v140_v1 }
  0xa3   :  { %1464 = vrot.lane.b32.xlu1 %v3803_v22, %s3662_s0  ;;  %473 = vmatprep.subr.bf16.mxu1 %v140_v1  ;;  %v1784_v1 = vld [vmem:[%s5198_s1 + $0x58] sm:$0xff] }
  0xa4   :  { %177 = vmatpush1.bf16.msra.mxu0 %v139_v2  ;;  %474 = vmatpush1.bf16.msra.mxu1 %v139_v2  ;;  %v364_v3 = vpop.permute.xlu0 %363  ;;  %v366_v6 = vpop.permute.xlu1 %365 }
  0xa5   :  { %714 = vmatprep.subr.bf16.mxu1 %v3750_v13  ;;  %v375_v7 = vsel %vm367_vm3, %v364_v3, %v366_v6 }
  0xa6   :  { %1466 = vrot.lane.b32.xlu0 %v3809_v23, %s3662_s0  ;;  %398 = vmatprep.subr.bf16.mxu0 %v375_v7 }
  0xa7   :  { %1462 = vrot.lane.b32.xlu1 %v3815_v24, %s3662_s0  ;;  %3109 = vmatmul.mubr.msk.bf16.vlgmr.msra.gmra.mxu0 %vm155_vm2, %v3594_v4  ;;  %v3606_v4 = vld [vmem:[%s5199_s2 + $0x98] sm:$0xff]  }
  0xa8   :  { %v362_v8 = vpop.permute.xlu0 %361  ;;  %3121 = vmatmul.mubr.msk.bf16.vlgmr.msra.gmra.mxu1 %vm155_vm2, %v3597_v5  ;;  %v358_v10 = vpop.permute.xlu1 %357  ;;  %204 = vmatprep.mubr.bf16.mxu0 %v5205_v12 }
  0xa9   :  { %v374_v9 = vsel %vm367_vm3, %v362_v8, %v364_v3  ;;  %715 = vmatpush1.bf16.msra.mxu1 %v3761_v15  ;;  %501 = vmatprep.mubr.bf16.mxu1 %v5205_v12  ;;  %v1800_v3 = vld [vmem:[%s5198_s1 + $0xd8] sm:$0xff]  ;;  %v3603_v8 = vld [vmem:[%s5199_s2 + $0x20] sm:$0xff]  }
  0xaa   :  { %1685 = vrot.lane.b32.xlu0 %v3750_v13, %s3663_s17  ;;  %399 = vmatpush1.bf16.msra.mxu0 %v374_v9  ;;  %v1783_v9 = vld [vmem:[%s5198_s1 + $0x50] sm:$0xff] }
  0xab   :  { %1687 = vrot.lane.b32.xlu1 %v3755_v14, %s3663_s17  ;;  %716 = vmatprep.subr.bf16.mxu1 %v3767_v16 }
  0xac   :  { %v360_v11 = vpop.permute.xlu0 %359  ;;  %v356_v27 = vpop.permute.xlu1 %355 }
  0xad   :  { %v373_v28 = vsel %vm367_vm3, %v358_v10, %v360_v11  ;;  %717 = vmatpush1.bf16.msra.mxu1 %v3779_v18  ;;  %v372_v14 = vsel %vm367_vm3, %v356_v27, %v358_v10  ;;  %v1799_v11 = vld [vmem:[%s5198_s1 + $0xd0] sm:$0xff]  ;;  %v1782_v27 = vld [vmem:[%s5198_s1 + $0x48] sm:$0xff] }
  0xae   :  { %1683 = vrot.lane.b32.xlu0 %v3761_v15, %s3663_s17  ;;  %400 = vmatprep.subr.bf16.mxu0 %v373_v28 }
  0xaf   :  { %1679 = vrot.lane.b32.xlu1 %v3767_v16, %s3663_s17  ;;  %401 = vmatpush1.bf16.msra.mxu0 %v372_v14  ;;  %v1798_v14 = vld [vmem:[%s5198_s1 + $0xc8] sm:$0xff] }
  0xb0   :  { %v352_v29 = vpop.permute.xlu0 %351  ;;  %3110 = vmatmul.mubr.msk.bf16.gmra.mxu0 %vm155_vm2, %v3595_v25  ;;  %3122 = vmatmul.mubr.msk.bf16.gmra.mxu1 %vm155_vm2, %v3599_v26  ;;  %v354_v30 = vpop.permute.xlu1 %353 }
  0xb1   :  { %422 = vmatprep.mubr.bf16.mxu0 %v5205_v12  ;;  %718 = vmatprep.subr.bf16.mxu1 %v3785_v19  ;;  %v371_v31 = vsel %vm367_vm3, %v352_v29, %v354_v30 }
  0xb2   :  { %1681 = vrot.lane.b32.xlu0 %v3773_v17, %s3663_s17  ;;  %719 = vmatpush1.bf16.msra.mxu1 %v3797_v21 }
  0xb3   :  { %1677 = vrot.lane.b32.xlu1 %v3779_v18, %s3663_s17  ;;  %402 = vmatprep.subr.bf16.mxu0 %v371_v31  ;;  %v3605_v31 = vld [vmem:[%s5199_s2 + $0x28] sm:$0xff]  }
  0xb4   :  { %v350_v32 = vpop.permute.xlu0 %349  ;;  %720 = vmatprep.subr.bf16.mxu1 %v3803_v22  ;;  %738 = vmatprep.mubr.bf16.mxu1 %v5205_v12  ;;  %v346_v34 = vpop.permute.xlu1 %345 }
  0xb5   :  { %v370_v33 = vsel %vm367_vm3, %v350_v32, %v352_v29  ;;  %v1781_v32 = vld [vmem:[%s5198_s1 + $0x40] sm:$0xff] }
  0xb6   :  { %1673 = vrot.lane.b32.xlu0 %v3785_v19, %s3663_s17  ;;  %403 = vmatpush1.bf16.msra.mxu0 %v370_v33 }
  0xb7   :  { %1675 = vrot.lane.b32.xlu1 %v3791_v20, %s3663_s17  ;;  %721 = vmatpush1.bf16.msra.mxu1 %v3815_v24  ;;  %v3598_v20 = vld [vmem:[%s5199_s2 + $0x50] sm:$0xff]  }
  0xb8   :  { %v348_v17 = vpop.permute.xlu0 %347  ;;  %876 = vmatprep.subr.bf16.mxu1 %v3750_v13  ;;  %v344_v36 = vpop.permute.xlu1 %343 }
  0xb9   :  { %v369_v37 = vsel %vm367_vm3, %v346_v34, %v348_v17  ;;  %v368_v38 = vsel %vm367_vm3, %v344_v36, %v346_v34  ;;  %v1797_v34 = vld [vmem:[%s5198_s1 + $0xc0] sm:$0xff] }
  0xba   :  { %1671 = vrot.lane.b32.xlu0 %v3797_v21, %s3663_s17  ;;  %404 = vmatprep.subr.bf16.mxu0 %v369_v37  ;;  %v1780_v37 = vld [vmem:[%s5198_s1 + $0x38] sm:$0xff] }
  0xbb   :  { %1667 = vrot.lane.b32.xlu1 %v3803_v22, %s3663_s17  ;;  %405 = vmatpush1.bf16.msra.mxu0 %v368_v38 }
  0xbc   :  { %v547_v39 = vpop.permute.xlu0 %546  ;;  %3137 = vmatmul.mubr.msk.bf16.vlgmr.msra.gmra.mxu1 %vm155_vm2, %v3601_v35  ;;  %v549_v40 = vpop.permute.xlu1 %548 }
  0xbd   :  { %877 = vmatpush1.bf16.msra.mxu1 %v3761_v15  ;;  %748 = vmatprep.mubr.bf16.mxu1 %v5205_v12  ;;  %v3963_v41 = vsel %vm550_vm4, %v547_v39, %v549_v40 }
  0xbe   :  { %1669 = vrot.lane.b32.xlu0 %v3809_v23, %s3663_s17  ;;  %3117 = vmatmul.mubr.msk.bf16.vlgmr.msra.gmra.mxu0 %vm155_vm2, %v3598_v20  ;;  %v3602_v23 = vld [vmem:[%s5199_s2 + $0x38] sm:$0xff]  }
  0xbf   :  { %1665 = vrot.lane.b32.xlu1 %v3815_v24, %s3663_s17  ;;  %581 = vmatprep.subr.bf16.mxu0 %v3963_v41  ;;  %v1796_v20 = vld [vmem:[%s5198_s1 + $0xb8] sm:$0xff] }
  0xc0   :  { %v545_v43 = vpop.permute.xlu0 %544  ;;  %432 = vmatprep.mubr.bf16.mxu0 %v5205_v12  ;;  %878 = vmatprep.subr.bf16.mxu1 %v3767_v16  ;;  %v541_v46 = vpop.permute.xlu1 %540 }
  0xc1   :  { %v3980_v45 = vsel %vm550_vm4, %v545_v43, %v547_v39  ;;  %879 = vmatpush1.bf16.msra.mxu1 %v3779_v18  ;;  %v3607_v43 = vld [vmem:[%s5199_s2 + $0x60] sm:$0xff]  }
  0xc2   :  { %1962 = vperm.xlu0 %3559, %v1804_v42   ;;  %582 = vmatpush1.bf16.msra.mxu0 %v3980_v45  ;;  %v1779_v42 = vld [vmem:[%s5198_s1 + $0x30] sm:$0xff] }
  0xc3   :  { %1882 = vperm.xlu1 %3560, %v1788_v44   ;;  %880 = vmatprep.subr.bf16.mxu1 %v3785_v19 }
  0xc4   :  { %v543_v49 = vpop.permute.xlu0 %542  ;;  %3138 = vmatmul.mubr.msk.bf16.gmra.mxu1 %vm155_vm2, %v3602_v23  ;;  %v539_v51 = vpop.permute.xlu1 %538  ;;  %v1795_v23 = vld [vmem:[%s5198_s1 + $0xb0] sm:$0xff] }
  0xc5   :  { %v3996_v52 = vsel %vm550_vm4, %v541_v46, %v543_v49  ;;  %881 = vmatpush1.bf16.msra.mxu1 %v3797_v21  ;;  %900 = vmatprep.mubr.bf16.mxu1 %v5205_v12  ;;  %v4001_v53 = vsel %vm550_vm4, %v539_v51, %v541_v46 }
  0xc6   :  { %1877 = vperm.xlu0 %3559, %v1787_v48   ;;  %3118 = vmatmul.mubr.msk.bf16.gmra.mxu0 %vm155_vm2, %v3600_v47  ;;  %v1778_v48 = vld [vmem:[%s5198_s1 + $0x28] sm:$0xff] }
  0xc7   :  { %1957 = vperm.xlu1 %3560, %v1803_v50   ;;  %583 = vmatprep.subr.bf16.mxu0 %v3996_v52  ;;  %v1794_v50 = vld [vmem:[%s5198_s1 + $0xa8] sm:$0xff] }
  0xc8   :  { %584 = vmatpush1.bf16.msra.mxu0 %v4001_v53  ;;  %v535_v55 = vpop.permute.xlu0 %534  ;;  %882 = vmatprep.subr.bf16.mxu1 %v3803_v22  ;;  %v537_v58 = vpop.permute.xlu1 %536 }
  0xc9   :  { %605 = vmatprep.mubr.bf16.mxu0 %v5205_v12  ;;  %883 = vmatpush1.bf16.msra.mxu1 %v3815_v24  ;;  %v4019_v59 = vsel %vm550_vm4, %v535_v55, %v537_v58 }
  0xca   :  { %1872 = vperm.xlu0 %3559, %v1786_v54   ;;  %585 = vmatprep.subr.bf16.mxu0 %v4019_v59 }
  0xcb   :  { %1952 = vperm.xlu1 %3560, %v1802_v56  }
  0xcc   :  { %v533_v61 = vpop.permute.xlu0 %532  ;;  %3145 = vmatmul.mubr.msk.bf16.vlgmr.msra.gmra.mxu1 %vm155_vm2, %v3604_v57  ;;  %v529_v0 = vpop.permute.xlu1 %528  ;;  %v1793_v57 = vld [vmem:[%s5198_s1 + $0xa0] sm:$0xff] }
  0xcd   :  { %v4030_v63 = vsel %vm550_vm4, %v533_v61, %v535_v55  ;;  %910 = vmatprep.mubr.bf16.mxu1 %v5205_v12  ;;  %v3608_v55 = vld [vmem:[%s5199_s2 + $0x68] sm:$0xff]   ;;  %v3611_v61 = vld [vmem:[%s5199_s2 + $0x78] sm:$0xff]  }
  0xce   :  { %1867 = vperm.xlu0 %3559, %v1785_v60   ;;  %586 = vmatpush1.bf16.msra.mxu0 %v4030_v63 }
  0xcf   :  { %1947 = vperm.xlu1 %3560, %v1801_v62   ;;  %v1775_v62 = vld [vmem:[%s5198_s1 + $0x10] sm:$0xff] }
  0xd0   :  { %v531_v2 = vpop.permute.xlu0 %530  ;;  %v527_v5 = vpop.permute.xlu1 %526 }
  0xd1   :  { %v4044_v6 = vsel %vm550_vm4, %v529_v0, %v531_v2  ;;  %v4047_v7 = vsel %vm550_vm4, %v527_v5, %v529_v0  ;;  %v1791_v0 = vld [vmem:[%s5198_s1 + $0x90] sm:$0xff] }
  0xd2   :  { %1862 = vperm.xlu0 %3559, %v1784_v1   ;;  %587 = vmatprep.subr.bf16.mxu0 %v4044_v6 }
  0xd3   :  { %1942 = vperm.xlu1 %3560, %v1800_v3   ;;  %588 = vmatpush1.bf16.msra.mxu0 %v4047_v7 }
  0xd4   :  { %v1097_v10 = vpop.permute.xlu0 %1096  ;;  %795 = vmatprep.subr.bf16.mxu0 %v3750_v13  ;;  %3146 = vmatmul.mubr.msk.bf16.gmra.mxu1 %vm155_vm2, %v3606_v4  ;;  %v1099_v25 = vpop.permute.xlu1 %1098  ;;  %v1773_v4 = vld [vmem:[%s5198_s1] sm:$0xff] }
  0xd5   :  { %1155 = vmatprep.mubr.bf16.mxu1 %v5205_v12  ;;  %v4065_v26 = vsel %vm1100_vm5, %v1097_v10, %v1099_v25  ;;  %v3614_v25 = vld [vmem:[%s5199_s2 + $0xd0] sm:$0xff]  }
  0xd6   :  { %1857 = vperm.xlu0 %3559, %v1783_v9   ;;  %3125 = vmatmul.mubr.msk.bf16.vlgmr.msra.gmra.mxu0 %vm155_vm2, %v3603_v8 }
  0xd7   :  { %1937 = vperm.xlu1 %3560, %v1799_v11   ;;  %1131 = vmatprep.subr.bf16.mxu1 %v4065_v26 }
  0xd8   :  { %796 = vmatpush1.bf16.msra.mxu0 %v3761_v15  ;;  %v1095_v28 = vpop.permute.xlu0 %1094  ;;  %615 = vmatprep.mubr.bf16.mxu0 %v5205_v12  ;;  %v1091_v30 = vpop.permute.xlu1 %1090 }
  0xd9   :  { %v4077_v29 = vsel %vm1100_vm5, %v1095_v28, %v1097_v10  ;;  %797 = vmatprep.subr.bf16.mxu0 %v3767_v16 }
  0xda   :  { %1852 = vperm.xlu0 %3559, %v1782_v27   ;;  %1132 = vmatpush1.bf16.msra.mxu1 %v4077_v29 }
  0xdb   :  { %1932 = vperm.xlu1 %3560, %v1798_v14   ;;  %v3616_v14 = vld [vmem:[%s5199_s2 + $0xc8] sm:$0xff]  }
  0xdc   :  { %798 = vmatpush1.bf16.msra.mxu0 %v3779_v18  ;;  %v1093_v33 = vpop.permute.xlu0 %1092  ;;  %v1089_v17 = vpop.permute.xlu1 %1088 }
  0xdd   :  { %799 = vmatprep.subr.bf16.mxu0 %v3785_v19  ;;  %v4093_v35 = vsel %vm1100_vm5, %v1091_v30, %v1093_v33  ;;  %v4096_v36 = vsel %vm1100_vm5, %v1089_v17, %v1091_v30  ;;  %v3615_v17 = vld [vmem:[%s5199_s2 + $0xd8] sm:$0xff]  }
  0xde   :  { %1847 = vperm.xlu0 %3559, %v1781_v32   ;;  %3126 = vmatmul.mubr.msk.bf16.gmra.mxu0 %vm155_vm2, %v3605_v31 }
  0xdf   :  { %1927 = vperm.xlu1 %3560, %v1797_v34   ;;  %1133 = vmatprep.subr.bf16.mxu1 %v4093_v35 }
  0xe0   :  { %800 = vmatpush1.bf16.msra.mxu0 %v3797_v21  ;;  %1134 = vmatpush1.bf16.msra.mxu1 %v4096_v36  ;;  %v1085_v38 = vpop.permute.xlu0 %1084  ;;  %v1087_v39 = vpop.permute.xlu1 %1086 }
  0xe1   :  { %801 = vmatprep.subr.bf16.mxu0 %v3803_v22  ;;  %819 = vmatprep.mubr.bf16.mxu0 %v5205_v12  ;;  %v4111_v40 = vsel %vm1100_vm5, %v1085_v38, %v1087_v39 }
  0xe2   :  { %1842 = vperm.xlu0 %3559, %v1780_v37   ;;  %1135 = vmatprep.subr.bf16.mxu1 %v4111_v40 }
  0xe3   :  { %1922 = vperm.xlu1 %3560, %v1796_v20  }
  0xe4   :  { %802 = vmatpush1.bf16.msra.mxu0 %v3815_v24  ;;  %v1083_v44 = vpop.permute.xlu0 %1082  ;;  %v1079_v47 = vpop.permute.xlu1 %1078 }
  0xe5   :  { %v4125_v46 = vsel %vm1100_vm5, %v1083_v44, %v1085_v38  ;;  %945 = vmatprep.subr.bf16.mxu0 %v3963_v41 }
  0xe6   :  { %1837 = vperm.xlu0 %3559, %v1779_v42   ;;  %1136 = vmatpush1.bf16.msra.mxu1 %v4125_v46 }
  0xe7   :  { %1917 = vperm.xlu1 %3560, %v1795_v23   ;;  %3141 = vmatmul.mubr.msk.bf16.vlgmr.msra.gmra.mxu0 %vm155_vm2, %v3607_v43 }
  0xe8   :  { %946 = vmatpush1.bf16.msra.mxu0 %v3980_v45  ;;  %v1081_v49 = vpop.permute.xlu0 %1080  ;;  %829 = vmatprep.mubr.bf16.mxu0 %v5205_v12  ;;  %v1077_v41 = vpop.permute.xlu1 %1076  ;;  %v3609_v45 = vld [vmem:[%s5199_s2 + $0x70] sm:$0xff]  }
  0xe9   :  { %947 = vmatprep.subr.bf16.mxu0 %v3996_v52  ;;  %v4140_v51 = vsel %vm1100_vm5, %v1079_v47, %v1081_v49  ;;  %v4143_v54 = vsel %vm1100_vm5, %v1077_v41, %v1079_v47  ;;  %v1777_v52 = vld [vmem:[%s5198_s1 + $0x20] sm:$0xff]  ;;  %v3618_v41 = vld [vmem:[%s5199_s2 + $0xb0] sm:$0xff]  }
  0xea   :  { %1832 = vperm.xlu0 %3559, %v1778_v48   ;;  %1137 = vmatprep.subr.bf16.mxu1 %v4140_v51 }
  0xeb   :  { %1912 = vperm.xlu1 %3560, %v1794_v50   ;;  %1138 = vmatpush1.bf16.msra.mxu1 %v4143_v54 }
  0xec   :  { %948 = vmatpush1.bf16.msra.mxu0 %v4001_v53  ;;  %v4157_v56 = vpop.permute.xlu0 %1360  ;;  %1281 = vmatprep.subr.bf16.mxu1 %v3750_v13  ;;  %v1776_v53 = vld [vmem:[%s5198_s1 + $0x18] sm:$0xff] }
  0xed   :  { %949 = vmatprep.subr.bf16.mxu0 %v4019_v59  ;;  %v4164_v58 = vpop.permute.xlu1 %1362  ;;  %v1792_v13 = vld [vmem:[%s5198_s1 + $0x98] sm:$0xff] }
  0xee   :  { %1827 = vperm.xlu0 %3559, %v1777_v52   ;;  %3165 = vmatmul.mubr.msk.bf16.vlgmr.msra.gmra.mxu1 %vm155_vm2, %v3609_v45  ;;  %v1372_v27 = vsel %vm1364_vm7, %v4157_v56, %v4164_v58  ;;  %v3619_v45 = vld [vmem:[%s5199_s2 + $0xa8] sm:$0xff]   ;;  %v3620_v58 = vld [vmem:[%s5199_s2 + $0xb8] sm:$0xff]  }
  0xef   :  { %1907 = vperm.xlu1 %3560, %v1793_v57   ;;  %3142 = vmatmul.mubr.msk.bf16.gmra.mxu0 %vm155_vm2, %v3608_v55 }
  0xf0   :  { %950 = vmatpush1.bf16.msra.mxu0 %v4030_v63  ;;  %v4172_v60 = vpop.permute.xlu0 %1358  ;;  %1282 = vmatpush1.bf16.msra.mxu1 %v3761_v15  ;;  %v3610_v15 = vld [vmem:[%s5199_s2 + $0x80] sm:$0xff]  }
  0xf1   :  { %951 = vmatprep.subr.bf16.mxu0 %v4044_v6  ;;  %v1483_v59 = vpop.permute.xlu1 %1482  ;;  %969 = vmatprep.mubr.bf16.mxu0 %v5205_v12  ;;  %v3613_v6 = vld [vmem:[%s5199_s2 + $0xc0] sm:$0xff]   ;;  %v1371_v30 = vsel %vm1364_vm7, %v4172_v60, %v4157_v56 }
  0xf2   :  { %1822 = vperm.xlu0 %3559, %v1776_v53   ;;  %1165 = vmatprep.mubr.bf16.mxu1 %v5205_v12 }
  0xf3   :  { %1902 = vperm.xlu1 %3560, %v1792_v13   ;;  %1283 = vmatprep.subr.bf16.mxu1 %v3767_v16  ;;  %v1774_v16 = vld [vmem:[%s5198_s1 + $0x8] sm:$0xff]  ;;  %v3621_v13 = vld [vmem:[%s5199_s2 + $0xe0] sm:$0xff]  }
  0xf4   :  { %952 = vmatpush1.bf16.msra.mxu0 %v4047_v7  ;;  %v1485_v63 = vpop.permute.xlu0 %1484  ;;  %1284 = vmatpush1.bf16.msra.mxu1 %v3779_v18  ;;  %v1790_v18 = vld [vmem:[%s5198_s1 + $0x88] sm:$0xff] }
  0xf5   :  { %1212 = vmatprep.subr.bf16.mxu0 %v4065_v26  ;;  %v1481_v1 = vpop.permute.xlu1 %1480  ;;  %1285 = vmatprep.subr.bf16.mxu1 %v3785_v19  ;;  %v4212_v3 = vsel %vm1486_vm6, %v1483_v59, %v1485_v63 }
  0xf6   :  { %1817 = vperm.xlu0 %3559, %v1775_v62   ;;  %3166 = vmatmul.mubr.msk.bf16.gmra.mxu1 %vm155_vm2, %v3611_v61  ;;  %v4232_v8 = vsel %vm1486_vm6, %v1481_v1, %v1483_v59 }
  0xf7   :  { %1897 = vperm.xlu1 %3560, %v1791_v0   ;;  %3149 = vmatmul.mubr.msk.bf16.vlgmr.msra.gmra.mxu0 %vm155_vm2, %v3610_v15 }
  0xf8   :  { %1213 = vmatpush1.bf16.msra.mxu0 %v4077_v29  ;;  %v1355_v2 = vpop.permute.xlu0 %1354  ;;  %1286 = vmatpush1.bf16.msra.mxu1 %v3797_v21  ;;  %v3612_v21 = vld [vmem:[%s5199_s2 + $0x88] sm:$0xff]  }
  0xf9   :  { %1214 = vmatprep.subr.bf16.mxu0 %v4093_v35  ;;  %v1357_v19 = vpop.permute.xlu1 %1356  ;;  %979 = vmatprep.mubr.bf16.mxu0 %v5205_v12 }
  0xfa   :  { %1812 = vperm.xlu0 %3559, %v1774_v16   ;;  %1287 = vmatprep.subr.bf16.mxu1 %v3803_v22  ;;  %v1789_v22 = vld [vmem:[%s5198_s1 + $0x80] sm:$0xff]  ;;  %v1370_v29 = vsel %vm1364_vm7, %v1355_v2, %v1357_v19 }
  0xfb   :  { %1892 = vperm.xlu1 %3560, %v1790_v18   ;;  %1305 = vmatprep.mubr.bf16.mxu1 %v5205_v12 }
  0xfc   :  { %1215 = vmatpush1.bf16.msra.mxu0 %v4096_v36  ;;  %v1353_v5 = vpop.permute.xlu0 %1352  ;;  %1288 = vmatpush1.bf16.msra.mxu1 %v3815_v24 }
  0xfd   :  { %1216 = vmatprep.subr.bf16.mxu0 %v4111_v40  ;;  %v1477_v7 = vpop.permute.xlu1 %1476  ;;  %1517 = vmatprep.subr.bf16.mxu1 %v4212_v3  ;;  %v1369_v32 = vsel %vm1364_vm7, %v1353_v5, %v1355_v2  ;;  %v3622_v2 = vld [vmem:[%s5199_s2 + $0xe8] sm:$0xff]   ;;  %v3624_v5 = vld [vmem:[%s5199_s2 + $0xf8] sm:$0xff]  }
  0xfe   :  { %1807 = vperm.xlu0 %3559, %v1773_v4  }
  0xff   :  { %1887 = vperm.xlu1 %3560, %v1789_v22   ;;  %3150 = vmatmul.mubr.msk.bf16.gmra.mxu0 %vm155_vm2, %v3612_v21  ;;  %v3623_v21 = vld [vmem:[%s5199_s2 + $0xf0] sm:$0xff]  }
 0x100   :  { %1217 = vmatpush1.bf16.msra.mxu0 %v4125_v46  ;;  %v1479_v9 = vpop.permute.xlu0 %1478  ;;  %3173 = vmatmul.mubr.msk.bf16.vlgmr.msra.gmra.mxu1 %vm155_vm2, %v3613_v6  ;;  %v3617_v46 = vld [vmem:[%s5199_s2 + $0xa0] sm:$0xff]  }
 0x101   :  { %1218 = vmatprep.subr.bf16.mxu0 %v4140_v51  ;;  %v1475_v24 = vpop.permute.xlu1 %1474  ;;  %1518 = vmatpush1.bf16.msra.mxu1 %v4232_v8  ;;  %v1492_v10 = vsel %vm1486_vm6, %v1477_v7, %v1479_v9 }
 0x102   :  { %v4241_v11 = vsel %vm1486_vm6, %v1475_v24, %v1477_v7  ;;  %1236 = vmatprep.mubr.bf16.mxu0 %v5205_v12  ;;  %1519 = vmatprep.subr.bf16.mxu1 %v1492_v10 }
 0x103   :  { %1315 = vmatprep.mubr.bf16.mxu1 %v5205_v12 }
 0x104   :  { %1219 = vmatpush1.bf16.msra.mxu0 %v4143_v54  ;;  %v1349_v26 = vpop.permute.xlu0 %1348 }
 0x105   :  { %1395 = vmatprep.subr.bf16.mxu0 %v1372_v27  ;;  %v1351_v28 = vpop.permute.xlu1 %1350  ;;  %1520 = vmatpush1.bf16.msra.mxu1 %v4241_v11 }
 0x106   :  { %v1368_v34 = vsel %vm1364_vm7, %v1349_v26, %v1351_v28 }
 0x107   :  { %3169 = vmatmul.mubr.msk.bf16.vlgmr.msra.gmra.mxu0 %vm155_vm2, %v3614_v25 }
 0x108   :  { %1396 = vmatpush1.bf16.msra.mxu0 %v1371_v30  ;;  %v1347_v31 = vpop.permute.xlu0 %1346  ;;  %1246 = vmatprep.mubr.bf16.mxu0 %v5205_v12 }
 0x109   :  { %v1471_v33 = vpop.permute.xlu1 %1470  ;;  %1397 = vmatprep.subr.bf16.mxu0 %v1370_v29  ;;  %3174 = vmatmul.mubr.msk.bf16.gmra.mxu1 %vm155_vm2, %v3616_v14  ;;  %v1367_v36 = vsel %vm1364_vm7, %v1347_v31, %v1349_v26 }
 0x10a   :  { %1541 = vmatprep.mubr.bf16.mxu1 %v5205_v12 }
 0x10c   :  { %1398 = vmatpush1.bf16.msra.mxu0 %v1369_v32  ;;  %v1473_v35 = vpop.permute.xlu0 %1472 }
 0x10d   :  { %v1469_v37 = vpop.permute.xlu1 %1468  ;;  %1399 = vmatprep.subr.bf16.mxu0 %v1368_v34  ;;  %v1490_v38 = vsel %vm1486_vm6, %v1471_v33, %v1473_v35 }
 0x10e   :  { %v1489_v20 = vsel %vm1486_vm6, %v1469_v37, %v1471_v33  ;;  %1521 = vmatprep.subr.bf16.mxu1 %v1490_v38 }
 0x10f   :  { %3170 = vmatmul.mubr.msk.bf16.gmra.mxu0 %vm155_vm2, %v3615_v17  ;;  %1522 = vmatpush1.bf16.msra.mxu1 %v1489_v20 }
 0x110   :  { %v1343_v39 = vpop.permute.xlu0 %1342  ;;  %1400 = vmatpush1.bf16.msra.mxu0 %v1367_v36  ;;  %1419 = vmatprep.mubr.bf16.mxu0 %v5205_v12 }
 0x111   :  { %v1345_v40 = vpop.permute.xlu1 %1344 }
 0x112   :  { %v1366_v42 = vsel %vm1364_vm7, %v1343_v39, %v1345_v40 }
 0x113   :  { %1401 = vmatprep.subr.bf16.mxu0 %v1366_v42 }
 0x114   :  { %v1341_v43 = vpop.permute.xlu0 %1340 }
 0x115   :  { %v1365_v44 = vsel %vm1364_vm7, %v1341_v43, %v1343_v39  ;;  %v1465_v23 = vpop.permute.xlu1 %1464 }
 0x116   :  { %1402 = vmatpush1.bf16.msra.mxu0 %v1365_v44 }
 0x117   :  { %1598 = vmatprep.subr.bf16.mxu0 %v4212_v3 }
 0x118   :  { %v1467_v47 = vpop.permute.xlu0 %1466 }
 0x119   :  { %3177 = vmatmul.mubr.msk.bf16.vlgmr.msra.gmra.mxu0 %vm155_vm2, %v3617_v46  ;;  %v1463_v48 = vpop.permute.xlu1 %1462  ;;  %v1488_v49 = vsel %vm1486_vm6, %v1465_v23, %v1467_v47 }
 0x11a   :  { %v1487_v50 = vsel %vm1486_vm6, %v1463_v48, %v1465_v23  ;;  %1523 = vmatprep.subr.bf16.mxu1 %v1488_v49  ;;  %1599 = vmatpush1.bf16.msra.mxu0 %v4232_v8 }
 0x11b   :  { %1524 = vmatpush1.bf16.msra.mxu1 %v1487_v50  ;;  %1600 = vmatprep.subr.bf16.mxu0 %v1492_v10 }
 0x11c   :  { %v1686_v51 = vpop.permute.xlu0 %1685  ;;  %1429 = vmatprep.mubr.bf16.mxu0 %v5205_v12 }
 0x11d   :  { %v1688_v54 = vpop.permute.xlu1 %1687 }
 0x11e   :  { %3181 = vmatmul.mubr.msk.bf16.vlgmr.msra.gmra.mxu1 %vm155_vm2, %v3618_v41  ;;  %1601 = vmatpush1.bf16.msra.mxu0 %v4241_v11  ;;  %v1697_v52 = vsel %vm1689_vm8, %v1686_v51, %v1688_v54 }
 0x11f   :  { %1602 = vmatprep.subr.bf16.mxu0 %v1490_v38  ;;  %1551 = vmatprep.mubr.bf16.mxu1 %v5205_v12 }
 0x120   :  { %v1684_v55 = vpop.permute.xlu0 %1683  ;;  %1720 = vmatprep.subr.bf16.mxu1 %v1697_v52 }
 0x121   :  { %v1696_v56 = vsel %vm1689_vm8, %v1684_v55, %v1686_v51  ;;  %3178 = vmatmul.mubr.msk.bf16.gmra.mxu0 %vm155_vm2, %v3619_v45  ;;  %v1680_v57 = vpop.permute.xlu1 %1679 }
 0x122   :  { %1603 = vmatpush1.bf16.msra.mxu0 %v1489_v20  ;;  %1721 = vmatpush1.bf16.msra.mxu1 %v1696_v56 }
 0x123   :  { %1604 = vmatprep.subr.bf16.mxu0 %v1488_v49  ;;  %1622 = vmatprep.mubr.bf16.mxu0 %v5205_v12 }
 0x124   :  { %v1682_v53 = vpop.permute.xlu0 %1681 }
 0x125   :  { %v1678_v60 = vpop.permute.xlu1 %1677  ;;  %v1695_v59 = vsel %vm1689_vm8, %v1680_v57, %v1682_v53 }
 0x126   :  { %v1694_v61 = vsel %vm1689_vm8, %v1678_v60, %v1680_v57  ;;  %3182 = vmatmul.mubr.msk.bf16.gmra.mxu1 %vm155_vm2, %v3620_v58  ;;  %1605 = vmatpush1.bf16.msra.mxu0 %v1487_v50 }
 0x127   :  { %1722 = vmatprep.subr.bf16.mxu1 %v1695_v59  ;;  %1744 = vmatprep.mubr.bf16.mxu1 %v5205_v12 }
 0x128   :  { %v1674_v62 = vpop.permute.xlu0 %1673  ;;  %1723 = vmatpush1.bf16.msra.mxu1 %v1694_v61 }
 0x129   :  { %3185 = vmatmul.mubr.msk.bf16.vlgmr.msra.gmra.mxu0 %vm155_vm2, %v3621_v13  ;;  %v1676_v15 = vpop.permute.xlu1 %1675 }
 0x12a   :  { %v1693_v63 = vsel %vm1689_vm8, %v1674_v62, %v1676_v15  ;;  %1632 = vmatprep.mubr.bf16.mxu0 %v5205_v12 }
 0x12b   :  { %1724 = vmatprep.subr.bf16.mxu1 %v1693_v63 }
 0x12c   :  { %v1672_v0 = vpop.permute.xlu0 %1671 }
 0x12d   :  { %v1692_v1 = vsel %vm1689_vm8, %v1672_v0, %v1674_v62  ;;  %v1668_v16 = vpop.permute.xlu1 %1667 }
 0x12e   :  { %1725 = vmatpush1.bf16.msra.mxu1 %v1692_v1 }
 0x130   :  { %v1670_v18 = vpop.permute.xlu0 %1669 }
 0x131   :  { %3186 = vmatmul.mubr.msk.bf16.gmra.mxu0 %vm155_vm2, %v3622_v2  ;;  %v1666_v19 = vpop.permute.xlu1 %1665  ;;  %v1691_v3 = vsel %vm1689_vm8, %v1668_v16, %v1670_v18 }
 0x132   :  { %v1690_v4 = vsel %vm1689_vm8, %v1666_v19, %v1668_v16  ;;  %1726 = vmatprep.subr.bf16.mxu1 %v1691_v3 }
 0x133   :  { %1727 = vmatpush1.bf16.msra.mxu1 %v1690_v4 }
 0x136   :  { %3189 = vmatmul.mubr.msk.bf16.vlgmr.msra.gmra.mxu1 %vm155_vm2, %v3623_v21 }
 0x137   :  { %1754 = vmatprep.mubr.bf16.mxu1 %v5205_v12 }
 0x13d   :  { %v4326_v22 = vpop.permute.xlu0 %1962 }
 0x13e   :  { %5264 = vst [vmem:[#allocation5_spill] sm:$0xff] %v4326_v22  ;;  %v4328_v6 = vpop.permute.xlu1 %1882  ;;  %3190 = vmatmul.mubr.msk.bf16.gmra.mxu1 %vm155_vm2, %v3624_v5  ;;  %3195 = vmatprep.subr.mxu0 %v4326_v22 }
 0x13f   :  { %3239 = vmatprep.subr.mxu1 %v4326_v22  ;;  %3196 = vmatpush3.msra.mxu0 %v4328_v6 }
 0x140   :  { %3240 = vmatpush3.msra.mxu1 %v4328_v6 }
 0x141   :  { %v4335_v7 = vpop.permute.xlu0 %1877 }
 0x142   :  { %v4337_v8 = vpop.permute.xlu1 %1957 }
 0x143   :  { %3197 = vmatprep.subr.mxu0 %v4337_v8  ;;  %3241 = vmatprep.subr.mxu1 %v4337_v8 }
 0x144   :  { %3198 = vmatpush3.msra.mxu0 %v4335_v7  ;;  %3242 = vmatpush3.msra.mxu1 %v4335_v7 }
 0x145   :  { %v4343_v9 = vpop.permute.xlu0 %1872 }
 0x146   :  { %v4345_v24 = vpop.permute.xlu1 %1952 }
 0x147   :  { %3199 = vmatprep.subr.mxu0 %v4345_v24  ;;  %3243 = vmatprep.subr.mxu1 %v4345_v24 }
 0x148   :  { %3200 = vmatpush3.msra.mxu0 %v4343_v9  ;;  %3244 = vmatpush3.msra.mxu1 %v4343_v9 }
 0x149   :  { %v4351_v10 = vpop.permute.xlu0 %1867 }
 0x14a   :  { %v4353_v11 = vpop.permute.xlu1 %1947 }
 0x14b   :  { %3201 = vmatprep.subr.mxu0 %v4353_v11  ;;  %3245 = vmatprep.subr.mxu1 %v4353_v11 }
 0x14c   :  { %3202 = vmatpush3.msra.mxu0 %v4351_v10  ;;  %3246 = vmatpush3.msra.mxu1 %v4351_v10 }
 0x14d   :  { %v4359_v25 = vpop.permute.xlu0 %1862 }
 0x14e   :  { %v4361_v26 = vpop.permute.xlu1 %1942  ;;  %v4363_v27 = vpop.f32.mrf.mxu1 }
 0x14f   :  { %3203 = vmatprep.subr.mxu0 %v4361_v26  ;;  %3247 = vmatprep.subr.mxu1 %v4361_v26 }
 0x150   :  { %3204 = vmatpush3.msra.mxu0 %v4359_v25  ;;  %3248 = vmatpush3.msra.mxu1 %v4359_v25  ;;  %v4369_v28 = vpop.f32.mrf.mxu1 }
 0x151   :  { %v4371_v14 = vpop.permute.xlu0 %1857 }
 0x152   :  { %v4373_v29 = vpop.permute.xlu1 %1937  ;;  %v4375_v30 = vpop.f32.mrf.mxu1 }
 0x153   :  { %3205 = vmatprep.subr.mxu0 %v4373_v29  ;;  %3249 = vmatprep.subr.mxu1 %v4373_v29 }
 0x154   :  { %3206 = vmatpush3.msra.mxu0 %v4371_v14  ;;  %3250 = vmatpush3.msra.mxu1 %v4371_v14  ;;  %v4383_v32 = vpop.f32.mrf.mxu1 }
 0x155   :  { %v4381_v31 = vpop.permute.xlu0 %1852 }
 0x156   :  { %v4385_v33 = vpop.permute.xlu1 %1932 }
 0x157   :  { %3207 = vmatprep.subr.mxu0 %v4385_v33  ;;  %3251 = vmatprep.subr.mxu1 %v4385_v33 }
 0x158   :  { %3208 = vmatpush3.msra.mxu0 %v4381_v31  ;;  %3252 = vmatpush3.msra.mxu1 %v4381_v31 }
 0x159   :  { %v4391_v34 = vpop.permute.xlu0 %1847  ;;  %v4393_v17 = vpop.f32.mrf.mxu1 }
 0x15a   :  { %v4395_v35 = vpop.permute.xlu1 %1927 }
 0x15b   :  { %3209 = vmatprep.subr.mxu0 %v4395_v35  ;;  %3253 = vmatprep.subr.mxu1 %v4395_v35  ;;  %v4401_v36 = vpop.f32.mrf.mxu1 }
 0x15c   :  { %3210 = vmatpush3.msra.mxu0 %v4391_v34  ;;  %3254 = vmatpush3.msra.mxu1 %v4391_v34 }
 0x15d   :  { %v4403_v37 = vpop.permute.xlu0 %1842  ;;  %v4411_v20 = vpop.f32.mrf.mxu1 }
 0x15e   :  { %v4405_v38 = vpop.permute.xlu1 %1922 }
 0x15f   :  { %3211 = vmatprep.subr.mxu0 %v4405_v38  ;;  %3255 = vmatprep.subr.mxu1 %v4405_v38  ;;  %v4421_v42 = vpop.f32.mrf.mxu1 }
 0x160   :  { %3212 = vmatpush3.msra.mxu0 %v4403_v37  ;;  %3256 = vmatpush3.msra.mxu1 %v4403_v37 }
 0x161   :  { %v4413_v39 = vpop.permute.xlu0 %1837 }
 0x162   :  { %v4415_v40 = vpop.permute.xlu1 %1917 }
 0x163   :  { %3213 = vmatprep.subr.mxu0 %v4415_v40  ;;  %3257 = vmatprep.subr.mxu1 %v4415_v40 }
 0x164   :  { %3214 = vmatpush3.msra.mxu0 %v4413_v39  ;;  %3258 = vmatpush3.msra.mxu1 %v4413_v39 }
 0x165   :  { %v4423_v43 = vpop.permute.xlu0 %1832 }
 0x166   :  { %5265 = vst [vmem:[#allocation6_spill] sm:$0xff] %v4423_v43  ;;  %v4425_v44 = vpop.permute.xlu1 %1912 }
 0x167   :  { %3215 = vmatprep.subr.mxu0 %v4425_v44  ;;  %3259 = vmatprep.subr.mxu1 %v4425_v44  ;;  %v4429_v23 = vpop.f32.mrf.mxu0 }
 0x168   :  { %3216 = vmatpush3.msra.mxu0 %v4423_v43  ;;  %3260 = vmatpush3.msra.mxu1 %v4423_v43  ;;  %v4433_v46 = vpop.f32.mrf.mxu1 }
 0x169   :  { %v4435_v47 = vpop.permute.xlu0 %1827  ;;  %v4439_v49 = vpop.f32.mrf.mxu0 }
 0x16a   :  { %5266 = vst [vmem:[#allocation7_spill] sm:$0xff] %v4435_v47  ;;  %v4437_v48 = vpop.permute.xlu1 %1907  ;;  %v4443_v50 = vpop.f32.mrf.mxu1 }
 0x16b   :  { %5267 = vst [vmem:[#allocation8_spill] sm:$0xff] %v4437_v48  ;;  %3217 = vmatprep.subr.mxu0 %v4437_v48  ;;  %3261 = vmatprep.subr.mxu1 %v4437_v48  ;;  %v4445_v41 = vpop.f32.mrf.mxu0 }
 0x16c   :  { %3218 = vmatpush3.msra.mxu0 %v4435_v47  ;;  %3262 = vmatpush3.msra.mxu1 %v4435_v47  ;;  %v4451_v54 = vpop.f32.mrf.mxu1  ;;  %v309_v47 = vadd.f32 %v4369_v28, %v4439_v49 }
 0x16d   :  { %v4449_v51 = vpop.permute.xlu0 %1822  ;;  %5269 = vst [vmem:[#allocation10_spill] sm:$0xff] %v4451_v54  ;;  %v202_v52 = vpop.f32.mrf.mxu0 }
 0x16e   :  { %5268 = vst [vmem:[#allocation9_spill] sm:$0xff] %v4449_v51  ;;  %v4453_v45 = vpop.permute.xlu1 %1902  ;;  %v4457_v55 = vpop.f32.mrf.mxu1 }
 0x16f   :  { %5270 = vst [vmem:[#allocation11_spill] sm:$0xff] %v4453_v45  ;;  %3219 = vmatprep.subr.mxu0 %v4453_v45  ;;  %3263 = vmatprep.subr.mxu1 %v4453_v45 }
 0x170   :  { %v4459_v56 = vpop.f32.mrf.mxu0  ;;  %3220 = vmatpush3.msra.mxu0 %v4449_v51  ;;  %3264 = vmatpush3.msra.mxu1 %v4449_v51  ;;  %v4465_v58 = vpop.f32.mrf.mxu1  ;;  %v307_v51 = vadd.f32 %v4363_v27, %v4429_v23 }
 0x171   :  { %v4463_v57 = vpop.permute.xlu0 %1817  ;;  %5272 = vst [vmem:[#allocation13_spill] sm:$0xff] %v4465_v58 }
 0x172   :  { %5271 = vst [vmem:[#allocation12_spill] sm:$0xff] %v4463_v57  ;;  %v4467_v53 = vpop.permute.xlu1 %1897  ;;  %v4471_v60 = vpop.f32.mrf.mxu1 }
 0x173   :  { %5273 = vst [vmem:[#allocation14_spill] sm:$0xff] %v4467_v53  ;;  %3221 = vmatprep.subr.mxu0 %v4467_v53  ;;  %3265 = vmatprep.subr.mxu1 %v4467_v53  ;;  %5274 = vst [vmem:[#allocation15_spill] sm:$0xff] %v4471_v60  ;;  %v208_v13 = vpop.f32.mrf.mxu0 }
 0x174   :  { %3222 = vmatpush3.msra.mxu0 %v4463_v57  ;;  %3266 = vmatpush3.msra.mxu1 %v4463_v57  ;;  %v4477_v61 = vpop.f32.mrf.mxu1 }
 0x175   :  { %v4475_v59 = vpop.permute.xlu0 %1812  ;;  %5276 = vst [vmem:[#allocation17_spill] sm:$0xff] %v4477_v61  ;;  %v210_v15 = vpop.f32.mrf.mxu0 }
 0x176   :  { %5275 = vst [vmem:[#allocation16_spill] sm:$0xff] %v4475_v59  ;;  %v4479_v62 = vpop.permute.xlu1 %1892  ;;  %v4485_v63 = vpop.f32.mrf.mxu1 }
 0x177   :  { %5277 = vst [vmem:[#allocation18_spill] sm:$0xff] %v4479_v62  ;;  %3223 = vmatprep.subr.mxu0 %v4479_v62  ;;  %3267 = vmatprep.subr.mxu1 %v4479_v62  ;;  %5278 = vst [vmem:[#allocation19_spill] sm:$0xff] %v4485_v63  ;;  %v212_v16 = vpop.f32.mrf.mxu0 }
 0x178   :  { %3224 = vmatpush3.msra.mxu0 %v4475_v59  ;;  %3268 = vmatpush3.msra.mxu1 %v4475_v59 }
 0x179   :  { %v4487_v0 = vpop.permute.xlu0 %1807 }
 0x17a   :  { %5279 = vst [vmem:[#allocation20_spill] sm:$0xff] %v4487_v0  ;;  %v4489_v1 = vpop.permute.xlu1 %1887 }
 0x17b   :  { %5280 = vst [vmem:[#allocation21_spill] sm:$0xff] %v4489_v1  ;;  %3225 = vmatprep.subr.mxu0 %v4489_v1  ;;  %3269 = vmatprep.subr.mxu1 %v4489_v1 }
 0x17c   :  { %3226 = vmatpush3.msra.mxu0 %v4487_v0  ;;  %3270 = vmatpush3.msra.mxu1 %v4487_v0  ;;  %v740_v2 = vpop.f32.mrf.mxu1 }
 0x17d   :  { %3283 = vmatprep.subr.mxu0 %v4326_v22  ;;  %3327 = vmatprep.subr.mxu1 %v4326_v22 }
 0x17e   :  { %v4497_v18 = vpop.f32.mrf.mxu0  ;;  %v742_v19 = vpop.f32.mrf.mxu1 }
 0x180   :  { %v4499_v3 = vpop.f32.mrf.mxu0  ;;  %v744_v4 = vpop.f32.mrf.mxu1 }
 0x182   :  { %v4501_v21 = vpop.f32.mrf.mxu0  ;;  %v746_v5 = vpop.f32.mrf.mxu1 }
 0x184   :  { %v4503_v12 = vpop.f32.mrf.mxu0  ;;  %v750_v1 = vpop.f32.mrf.mxu1 }
 0x186   :  { %v752_v61 = vpop.f32.mrf.mxu1  ;;  %v4505_v59 = vpop.f32.mrf.mxu0 }
 0x187   :  { %5281 = vst [vmem:[#allocation22_spill] sm:$0xff] %v4505_v59 }
 0x188   :  { %v754_v0 = vpop.f32.mrf.mxu1  ;;  %v4507_v62 = vpop.f32.mrf.mxu0 }
 0x189   :  { %5282 = vst [vmem:[#allocation23_spill] sm:$0xff] %v4507_v62 }
 0x18a   :  { %v756_v63 = vpop.f32.mrf.mxu1  ;;  %v4509_v22 = vpop.f32.mrf.mxu0 }
 0x18b   :  { %5283 = vst [vmem:[#allocation24_spill] sm:$0xff] %v4509_v22  ;;  %v311_v22 = vadd.f32 %v4375_v30, %v4445_v41  ;;  %v319_v30 = vadd.f32 %v4401_v36, %v208_v13 }
 0x18c   :  { %v4511_v57 = vpop.f32.mrf.mxu1  ;;  %v4513_v53 = vpop.f32.mrf.mxu0 }
 0x18d   :  { %5284 = vst [vmem:[#allocation25_spill] sm:$0xff] %v4511_v57  ;;  %5285 = vst [vmem:[#allocation26_spill] sm:$0xff] %v4513_v53  ;;  %v313_v53 = vadd.f32 %v4383_v32, %v202_v52 }
 0x18e   :  { %v4515_v58 = vpop.f32.mrf.mxu1 }
 0x18f   :  { %5286 = vst [vmem:[#allocation27_spill] sm:$0xff] %v4515_v58 }
 0x190   :  { %v4521_v48 = vpop.f32.mrf.mxu1 }
 0x192   :  { %v4530_v54 = vpop.f32.mrf.mxu1 }
 0x196   :  { %v607_v45 = vpop.f32.mrf.mxu0 }
 0x197   :  { %v626_v59 = vadd.f32 %v607_v45, %v307_v51  ;;  %v4543_v45 = vpop.f32.mrf.mxu1 }
 0x198   :  { %v609_v60 = vpop.f32.mrf.mxu0 }
 0x199   :  { %v627_v62 = vadd.f32 %v609_v60, %v309_v47  ;;  %v4528_v58 = vadd.f32 %v740_v2, %v626_v59  ;;  %v317_v47 = vadd.f32 %v4393_v17, %v4459_v56  ;;  %v321_v17 = vadd.f32 %v4411_v20, %v210_v15  ;;  %v4556_v13 = vpop.f32.mrf.mxu1 }
 0x19a   :  { %v611_v57 = vpop.f32.mrf.mxu0  ;;  %v323_v56 = vadd.f32 %v4421_v42, %v212_v16  ;;  %v496_v2 = vadd.f32 %v4443_v50, %v4499_v3  ;;  %v500_v50 = vadd.f32 %v4457_v55, %v4503_v12  ;;  %v5300_v12 = vld [vmem:[#allocation8_spill] sm:$0xff] }
 0x19b   :  { %v4526_v43 = vadd.f32 %v742_v19, %v627_v62  ;;  %5288 = vst [vmem:[#allocation29_spill] sm:$0xff] %v4528_v58  ;;  %v628_v27 = vadd.f32 %v611_v57, %v311_v22  ;;  %v4568_v15 = vpop.f32.mrf.mxu1 }
 0x19c   :  { %v613_v23 = vpop.f32.mrf.mxu0  ;;  %5295 = vst [vmem:[#allocation36_spill] sm:$0xff] %v4568_v15 }
 0x19d   :  { %5287 = vst [vmem:[#allocation28_spill] sm:$0xff] %v4526_v43  ;;  %v629_v28 = vadd.f32 %v613_v23, %v313_v53  ;;  %2122 = vmatprep.mubr.f32.mxu1 %v4526_v43  ;;  %v4540_v41 = vadd.f32 %v744_v4, %v628_v27  ;;  %v1966_v16 = vmul.f32 %v4526_v43, %v4526_v43 }
 0x19e   :  { %v617_v49 = vpop.f32.mrf.mxu0  ;;  %2123 = vmatmul.mubr.f32.vlgmr.msra.gmra.mxu1 %v4528_v58  ;;  %v494_v4 = vadd.f32 %v4433_v46, %v4497_v18  ;;  %v1965_v43 = vmul.f32 %v4528_v58, %v4528_v58  ;;  %v5324_v58 = vld [vmem:[#allocation5_spill] sm:$0xff] }
 0x19f   :  { %v4537_v32 = vadd.f32 %v746_v5, %v629_v28  ;;  %3328 = vmatpush3.msra.mxu1 %v4328_v6  ;;  %5290 = vst [vmem:[#allocation31_spill] sm:$0xff] %v4540_v41  ;;  %v630_v22 = vadd.f32 %v617_v49, %v317_v47 }
 0x1a0   :  { %3329 = vmatprep.subr.mxu1 %v4337_v8  ;;  %v619_v51 = vpop.f32.mrf.mxu0 }
 0x1a1   :  { %5289 = vst [vmem:[#allocation30_spill] sm:$0xff] %v4537_v32  ;;  %v631_v52 = vadd.f32 %v619_v51, %v319_v30  ;;  %3330 = vmatpush3.msra.mxu1 %v4335_v7  ;;  %2127 = vmatprep.mubr.f32.mxu1 %v4537_v32  ;;  %v4554_v53 = vadd.f32 %v750_v1, %v630_v22  ;;  %v5298_v30 = vld [vmem:[#allocation10_spill] sm:$0xff] }
 0x1a2   :  { %3331 = vmatprep.subr.mxu1 %v4345_v24  ;;  %v621_v36 = vpop.f32.mrf.mxu0  ;;  %2128 = vmatmul.mubr.f32.gmra.mxu1 %v4540_v41  ;;  %v498_v22 = vadd.f32 %v5298_v30, %v4501_v21  ;;  %v5304_v21 = vld [vmem:[#allocation7_spill] sm:$0xff] }
 0x1a3   :  { %v4551_v57 = vadd.f32 %v752_v61, %v631_v52  ;;  %3332 = vmatpush3.msra.mxu1 %v4343_v9  ;;  %5292 = vst [vmem:[#allocation33_spill] sm:$0xff] %v4554_v53  ;;  %v632_v60 = vadd.f32 %v621_v36, %v321_v17  ;;  %v5299_v17 = vld [vmem:[#allocation6_spill] sm:$0xff]  ;;  %v5301_v36 = vld [vmem:[#allocation23_spill] sm:$0xff] }
 0x1a4   :  { %3333 = vmatprep.subr.mxu1 %v4353_v11  ;;  %v623_v59 = vpop.f32.mrf.mxu0 }
 0x1a5   :  { %5291 = vst [vmem:[#allocation32_spill] sm:$0xff] %v4551_v57  ;;  %v633_v20 = vadd.f32 %v623_v59, %v323_v56  ;;  %3334 = vmatpush3.msra.mxu1 %v4351_v10  ;;  %2132 = vmatprep.mubr.f32.mxu1 %v4551_v57  ;;  %v4566_v62 = vadd.f32 %v754_v0, %v632_v60  ;;  %v4578_v0 = vpop.f32.mrf.mxu1  ;;  %v5302_v56 = vld [vmem:[#allocation15_spill] sm:$0xff] }
 0x1a6   :  { %3335 = vmatprep.subr.mxu1 %v4361_v26  ;;  %2133 = vmatmul.mubr.f32.gmra.mxu1 %v4554_v53  ;;  %v506_v60 = vadd.f32 %v5302_v56, %v5301_v36  ;;  %v5314_v36 = vld [vmem:[#allocation19_spill] sm:$0xff] }
 0x1a7   :  { %v4563_v42 = vadd.f32 %v756_v63, %v633_v20  ;;  %v821_v61 = vpop.f32.mrf.mxu0  ;;  %3336 = vmatpush3.msra.mxu1 %v4359_v25  ;;  %5294 = vst [vmem:[#allocation35_spill] sm:$0xff] %v4566_v62 }
 0x1a8   :  { %3337 = vmatprep.subr.mxu1 %v4373_v29  ;;  %v840_v28 = vadd.f32 %v821_v61, %v494_v4 }
 0x1a9   :  { %5293 = vst [vmem:[#allocation34_spill] sm:$0xff] %v4563_v42  ;;  %v823_v1 = vpop.f32.mrf.mxu0  ;;  %3338 = vmatpush3.msra.mxu1 %v4371_v14  ;;  %2137 = vmatprep.mubr.f32.mxu1 %v4563_v42 }
 0x1aa   :  { %3339 = vmatprep.subr.mxu1 %v4385_v33  ;;  %2138 = vmatmul.mubr.f32.gmra.mxu1 %v4566_v62  ;;  %v841_v27 = vadd.f32 %v823_v1, %v496_v2  ;;  %v5305_v1 = vld [vmem:[#allocation11_spill] sm:$0xff] }
 0x1ab   :  { %v825_v63 = vpop.f32.mrf.mxu0  ;;  %3340 = vmatpush3.msra.mxu1 %v4381_v31  ;;  %2300 = vmatprep.mubr.f32.mxu1 %v1966_v16 }
 0x1ac   :  { %3341 = vmatprep.subr.mxu1 %v4395_v35  ;;  %v842_v59 = vadd.f32 %v825_v63, %v498_v22  ;;  %v5307_v63 = vld [vmem:[#allocation9_spill] sm:$0xff]  ;;  %v5312_v22 = vld [vmem:[#allocation12_spill] sm:$0xff] }
 0x1ad   :  { %v827_v19 = vpop.f32.mrf.mxu0  ;;  %3342 = vmatpush3.msra.mxu1 %v4391_v34 }
 0x1ae   :  { %3343 = vmatprep.subr.mxu1 %v4405_v38  ;;  %v1157_v5 = vpop.f32.mrf.mxu1  ;;  %v843_v51 = vadd.f32 %v827_v19, %v500_v50  ;;  %v5310_v50 = vld [vmem:[#allocation14_spill] sm:$0xff] }
 0x1af   :  { %v831_v23 = vpop.f32.mrf.mxu0  ;;  %3344 = vmatpush3.msra.mxu1 %v4403_v37  ;;  %v4594_v46 = vadd.f32 %v1157_v5, %v840_v28  ;;  %v5308_v5 = vld [vmem:[#allocation22_spill] sm:$0xff] }
 0x1b0   :  { %3345 = vmatprep.subr.mxu1 %v4415_v40  ;;  %v1159_v47 = vpop.f32.mrf.mxu1 }
 0x1b1   :  { %v833_v3 = vpop.f32.mrf.mxu0  ;;  %v4591_v49 = vadd.f32 %v1159_v47, %v841_v27  ;;  %3346 = vmatpush3.msra.mxu1 %v4413_v39  ;;  %5297 = vst [vmem:[#allocation38_spill] sm:$0xff] %v4594_v46  ;;  %v5309_v27 = vld [vmem:[#allocation13_spill] sm:$0xff] }
 0x1b2   :  { %3347 = vmatprep.subr.mxu1 %v4425_v44  ;;  %v1161_v18 = vpop.f32.mrf.mxu1  ;;  %v845_v2 = vadd.f32 %v833_v3, %v506_v60  ;;  %v504_v28 = vadd.f32 %v5309_v27, %v5308_v5  ;;  %v5315_v60 = vld [vmem:[#allocation18_spill] sm:$0xff] }
 0x1b3   :  { %5296 = vst [vmem:[#allocation37_spill] sm:$0xff] %v4591_v49  ;;  %v835_v52 = vpop.f32.mrf.mxu0  ;;  %3348 = vmatpush3.msra.mxu1 %v5299_v17  ;;  %2037 = vmatprep.mubr.f32.mxu0 %v4591_v49  ;;  %v4611_v19 = vadd.f32 %v1161_v18, %v842_v59 }
 0x1b4   :  { %3349 = vmatprep.subr.mxu1 %v5300_v12  ;;  %v1163_v55 = vpop.f32.mrf.mxu1  ;;  %2038 = vmatmul.mubr.f32.vlgmr.msra.gmra.mxu0 %v4594_v46  ;;  %v844_v18 = vadd.f32 %v831_v23, %v504_v28 }
 0x1b5   :  { %v837_v20 = vpop.f32.mrf.mxu0  ;;  %v4605_v61 = vadd.f32 %v1163_v55, %v843_v51  ;;  %3284 = vmatpush3.msra.mxu0 %v4328_v6  ;;  %3350 = vmatpush3.msra.mxu1 %v5304_v21  ;;  %5306 = vst [vmem:[#allocation6_spill] sm:$0xff] %v4611_v19  ;;  %v5313_v55 = vld [vmem:[#allocation26_spill] sm:$0xff] }
 0x1b6   :  { %3285 = vmatprep.subr.mxu0 %v4337_v8  ;;  %3351 = vmatprep.subr.mxu1 %v5305_v1  ;;  %v1167_v16 = vpop.f32.mrf.mxu1  ;;  %v510_v56 = vadd.f32 %v5314_v36, %v5313_v55  ;;  %v5319_v55 = vld [vmem:[#allocation17_spill] sm:$0xff] }
 0x1b7   :  { %5303 = vst [vmem:[#allocation10_spill] sm:$0xff] %v4605_v61  ;;  %v4613_v4 = vpop.f32.mrf.mxu0  ;;  %3286 = vmatpush3.msra.mxu0 %v4335_v7  ;;  %3352 = vmatpush3.msra.mxu1 %v5307_v63  ;;  %v4635_v5 = vadd.f32 %v1167_v16, %v844_v18  ;;  %v5320_v16 = vld [vmem:[#allocation21_spill] sm:$0xff] }
 0x1b8   :  { %2042 = vmatprep.mubr.f32.mxu0 %v4605_v61  ;;  %3287 = vmatprep.subr.mxu0 %v4345_v24  ;;  %v1169_v47 = vpop.f32.mrf.mxu1  ;;  %v847_v27 = vadd.f32 %v837_v20, %v510_v56  ;;  %v5322_v20 = vld [vmem:[#allocation20_spill] sm:$0xff] }
 0x1b9   :  { %3353 = vmatprep.subr.mxu1 %v5310_v50  ;;  %v4622_v30 = vpop.f32.mrf.mxu0  ;;  %v4624_v3 = vadd.f32 %v1169_v47, %v845_v2  ;;  %2043 = vmatmul.mubr.f32.gmra.mxu0 %v4611_v19  ;;  %5316 = vst [vmem:[#allocation23_spill] sm:$0xff] %v4635_v5  ;;  %v5317_v2 = vld [vmem:[#allocation16_spill] sm:$0xff] }
 0x1ba   :  { %3288 = vmatpush3.msra.mxu0 %v4343_v9  ;;  %3354 = vmatpush3.msra.mxu1 %v5312_v22  ;;  %v1171_v51 = vpop.f32.mrf.mxu1  ;;  %v5318_v47 = vld [vmem:[#allocation24_spill] sm:$0xff] }
 0x1bb   :  { %5311 = vst [vmem:[#allocation8_spill] sm:$0xff] %v4624_v3  ;;  %3289 = vmatprep.subr.mxu0 %v4353_v11  ;;  %3355 = vmatprep.subr.mxu1 %v5315_v60  ;;  %v4633_v59 = vpop.f32.mrf.mxu0  ;;  %v508_v36 = vadd.f32 %v5319_v55, %v5318_v47  ;;  %v1968_v47 = vmul.f32 %v4537_v32, %v4537_v32 }
 0x1bc   :  { %3290 = vmatpush3.msra.mxu0 %v4351_v10  ;;  %3356 = vmatpush3.msra.mxu1 %v5317_v2  ;;  %v1173_v23 = vpop.f32.mrf.mxu1 }
 0x1bd   :  { %2047 = vmatprep.mubr.f32.mxu0 %v4624_v3  ;;  %3291 = vmatprep.subr.mxu0 %v4361_v26  ;;  %v4641_v28 = vpop.f32.mrf.mxu0  ;;  %v4649_v18 = vadd.f32 %v1173_v23, %v847_v27  ;;  %v846_v15 = vadd.f32 %v835_v52, %v508_v36  ;;  %v2144_v36 = vmul.f32 %v4591_v49, %v4591_v49 }
 0x1be   :  { %3357 = vmatprep.subr.mxu1 %v5320_v16  ;;  %2048 = vmatmul.mubr.f32.gmra.mxu0 %v4635_v5 }
 0x1bf   :  { %5321 = vst [vmem:[#allocation15_spill] sm:$0xff] %v4649_v18  ;;  %3292 = vmatpush3.msra.mxu0 %v4359_v25  ;;  %3358 = vmatpush3.msra.mxu1 %v5322_v20  ;;  %v4653_v56 = vpop.f32.mrf.mxu0  ;;  %v4664_v27 = vadd.f32 %v1171_v51, %v846_v15  ;;  %v1967_v15 = vmul.f32 %v4540_v41, %v4540_v41 }
 0x1c0   :  { %3293 = vmatprep.subr.mxu0 %v4373_v29  ;;  %2301 = vmatmul.mubr.f32.vlgmr.msra.gmra.mxu1 %v1965_v43  ;;  %v4658_v55 = vpop.f32.mrf.mxu1 }
 0x1c1   :  { %5323 = vst [vmem:[#allocation7_spill] sm:$0xff] %v4658_v55  ;;  %3415 = vmatprep.subr.mxu1 %v5324_v58  ;;  %3294 = vmatpush3.msra.mxu0 %v4371_v14  ;;  %v4662_v23 = vpop.f32.mrf.mxu0  ;;  %5325 = vst [vmem:[#allocation11_spill] sm:$0xff] %v4664_v27 }
 0x1c2   :  { %2305 = vmatprep.mubr.f32.mxu1 %v1968_v47  ;;  %3416 = vmatpush3.msra.mxu1 %v4328_v6  ;;  %v4667_v52 = vpop.f32.mrf.mxu1  ;;  %v1970_v47 = vmul.f32 %v4551_v57, %v4551_v57 }
 0x1c3   :  { %2052 = vmatprep.mubr.f32.mxu0 %v4649_v18  ;;  %3295 = vmatprep.subr.mxu0 %v4385_v33  ;;  %v4671_v43 = vpop.f32.mrf.mxu0 }
 0x1c4   :  { %3417 = vmatprep.subr.mxu1 %v4337_v8  ;;  %2053 = vmatmul.mubr.f32.gmra.mxu0 %v4664_v27  ;;  %v4686_v32 = vpop.f32.mrf.mxu1 }
 0x1c5   :  { %3296 = vmatpush3.msra.mxu0 %v4381_v31  ;;  %3418 = vmatpush3.msra.mxu1 %v4335_v7  ;;  %v4681_v51 = vpop.f32.mrf.mxu0  ;;  %5326 = vst [vmem:[#allocation9_spill] sm:$0xff] %v4686_v32 }
 0x1c6   :  { %3297 = vmatprep.subr.mxu0 %v4395_v35  ;;  %2215 = vmatprep.mubr.f32.mxu0 %v2144_v36  ;;  %v1969_v36 = vmul.f32 %v4554_v53, %v4554_v53 }
 0x1c7   :  { %2306 = vmatmul.mubr.f32.gmra.mxu1 %v1967_v15  ;;  %3419 = vmatprep.subr.mxu1 %v4345_v24  ;;  %v4689_v49 = vpop.f32.mrf.mxu0  ;;  %v4700_v15 = vpop.f32.mrf.mxu1 }
 0x1c8   :  { %5327 = vst [vmem:[#allocation22_spill] sm:$0xff] %v4689_v49  ;;  %3298 = vmatpush3.msra.mxu0 %v4391_v34  ;;  %2310 = vmatprep.mubr.f32.mxu1 %v1970_v47  ;;  %5328 = vst [vmem:[#allocation13_spill] sm:$0xff] %v4700_v15  ;;  %v1972_v47 = vmul.f32 %v4563_v42, %v4563_v42 }
 0x1c9   :  { %3420 = vmatpush3.msra.mxu1 %v4343_v9  ;;  %3299 = vmatprep.subr.mxu0 %v4405_v38  ;;  %v4694_v41 = vpop.f32.mrf.mxu0  ;;  %v4714_v53 = vpop.f32.mrf.mxu1 }
 0x1ca   :  { %3421 = vmatprep.subr.mxu1 %v4353_v11  ;;  %3300 = vmatpush3.msra.mxu0 %v4403_v37  ;;  %5331 = vst [vmem:[#allocation26_spill] sm:$0xff] %v4714_v53 }
 0x1cb   :  { %3422 = vmatpush3.msra.mxu1 %v4351_v10  ;;  %3301 = vmatprep.subr.mxu0 %v4415_v40  ;;  %v4706_v57 = vpop.f32.mrf.mxu0  ;;  %v4729_v53 = vpop.f32.mrf.mxu1 }
 0x1cc   :  { %5329 = vst [vmem:[#allocation14_spill] sm:$0xff] %v4706_v57  ;;  %2311 = vmatmul.mubr.f32.gmra.mxu1 %v1969_v36  ;;  %3423 = vmatprep.subr.mxu1 %v4361_v26  ;;  %v1971_v36 = vmul.f32 %v4566_v62, %v4566_v62  ;;  %5334 = vst [vmem:[#allocation16_spill] sm:$0xff] %v4729_v53 }
 0x1cd   :  { %3302 = vmatpush3.msra.mxu0 %v4413_v39  ;;  %2315 = vmatprep.mubr.f32.mxu1 %v1972_v47  ;;  %v4710_v32 = vpop.f32.mrf.mxu0 }
 0x1ce   :  { %5330 = vst [vmem:[#allocation12_spill] sm:$0xff] %v4710_v32  ;;  %3424 = vmatpush3.msra.mxu1 %v4359_v25  ;;  %3303 = vmatprep.subr.mxu0 %v4425_v44 }
 0x1cf   :  { %3425 = vmatprep.subr.mxu1 %v4373_v29  ;;  %3304 = vmatpush3.msra.mxu0 %v5299_v17  ;;  %v4720_v42 = vpop.f32.mrf.mxu0 }
 0x1d0   :  { %5332 = vst [vmem:[#allocation19_spill] sm:$0xff] %v4720_v42  ;;  %3426 = vmatpush3.msra.mxu1 %v4371_v14  ;;  %3305 = vmatprep.subr.mxu0 %v5300_v12  ;;  %v4743_v42 = vpop.f32.mrf.mxu1 }
 0x1d1   :  { %2316 = vmatmul.mubr.f32.gmra.mxu1 %v1971_v36  ;;  %3427 = vmatprep.subr.mxu1 %v4385_v33  ;;  %v4725_v47 = vpop.f32.mrf.mxu0  ;;  %5337 = vst [vmem:[#allocation21_spill] sm:$0xff] %v4743_v42  ;;  %v2146_v42 = vmul.f32 %v4605_v61, %v4605_v61 }
 0x1d2   :  { %5333 = vst [vmem:[#allocation18_spill] sm:$0xff] %v4725_v47  ;;  %3306 = vmatpush3.msra.mxu0 %v5304_v21  ;;  %3428 = vmatpush3.msra.mxu1 %v4381_v31  ;;  %v4757_v53 = vpop.f32.mrf.mxu1 }
 0x1d3   :  { %3307 = vmatprep.subr.mxu0 %v5305_v1  ;;  %3429 = vmatprep.subr.mxu1 %v4395_v35  ;;  %v4733_v62 = vpop.f32.mrf.mxu0  ;;  %5338 = vst [vmem:[#allocation20_spill] sm:$0xff] %v4757_v53 }
 0x1d4   :  { %5335 = vst [vmem:[#allocation24_spill] sm:$0xff] %v4733_v62  ;;  %3308 = vmatpush3.msra.mxu0 %v5307_v63  ;;  %3430 = vmatpush3.msra.mxu1 %v4391_v34  ;;  %v2143_v62 = vmul.f32 %v4594_v46, %v4594_v46  ;;  %v5339_v46 = vld [vmem:[#allocation27_spill] sm:$0xff] }
 0x1d5   :  { %3309 = vmatprep.subr.mxu0 %v5310_v50  ;;  %3431 = vmatprep.subr.mxu1 %v4405_v38  ;;  %v4739_v36 = vpop.f32.mrf.mxu0  ;;  %v974_v57 = vadd.f32 %v4622_v30, %v5339_v46 }
 0x1d6   :  { %5336 = vst [vmem:[#allocation17_spill] sm:$0xff] %v4739_v36  ;;  %3310 = vmatpush3.msra.mxu0 %v5312_v22  ;;  %3432 = vmatpush3.msra.mxu1 %v4403_v37 }
 0x1d7   :  { %3311 = vmatprep.subr.mxu0 %v5315_v60  ;;  %3433 = vmatprep.subr.mxu1 %v4415_v40 }
 0x1d8   :  { %3312 = vmatpush3.msra.mxu0 %v5317_v2  ;;  %3434 = vmatpush3.msra.mxu1 %v4413_v39 }
 0x1d9   :  { %3313 = vmatprep.subr.mxu0 %v5320_v16  ;;  %3435 = vmatprep.subr.mxu1 %v4425_v44  ;;  %v1421_v36 = vpop.f32.mrf.mxu0 }
 0x1da   :  { %3314 = vmatpush3.msra.mxu0 %v5322_v20  ;;  %3436 = vmatpush3.msra.mxu1 %v5299_v17 }
 0x1db   :  { %2216 = vmatmul.mubr.f32.vlgmr.msra.gmra.mxu0 %v2143_v62  ;;  %3371 = vmatprep.subr.mxu0 %v5324_v58  ;;  %v1423_v47 = vpop.f32.mrf.mxu0  ;;  %v2145_v62 = vmul.f32 %v4611_v19, %v4611_v19  ;;  %v5341_v19 = vld [vmem:[#allocation25_spill] sm:$0xff] }
 0x1dc   :  { %3437 = vmatprep.subr.mxu1 %v5300_v12  ;;  %2220 = vmatprep.mubr.f32.mxu0 %v2146_v42  ;;  %v2148_v42 = vmul.f32 %v4624_v3, %v4624_v3  ;;  %v1441_v46 = vadd.f32 %v1423_v47, %v974_v57  ;;  %v972_v55 = vadd.f32 %v4613_v4, %v5341_v19 }
 0x1dd   :  { %3372 = vmatpush3.msra.mxu0 %v4328_v6  ;;  %3438 = vmatpush3.msra.mxu1 %v5304_v21  ;;  %v1425_v15 = vpop.f32.mrf.mxu0  ;;  %v2147_v57 = vmul.f32 %v4635_v5, %v4635_v5  ;;  %v2150_v19 = vmul.f32 %v4649_v18, %v4649_v18 }
 0x1de   :  { %3373 = vmatprep.subr.mxu0 %v4337_v8  ;;  %3439 = vmatprep.subr.mxu1 %v5305_v1  ;;  %v1543_v61 = vpop.f32.mrf.mxu1 }
 0x1df   :  { %3374 = vmatpush3.msra.mxu0 %v4335_v7  ;;  %3440 = vmatpush3.msra.mxu1 %v5307_v63  ;;  %v1427_v30 = vpop.f32.mrf.mxu0 }
 0x1e0   :  { %2221 = vmatmul.mubr.f32.gmra.mxu0 %v2145_v62  ;;  %3375 = vmatprep.subr.mxu0 %v4345_v24  ;;  %v1545_v53 = vpop.f32.mrf.mxu1  ;;  %v1440_v62 = vadd.f32 %v1421_v36, %v972_v55  ;;  %v976_v36 = vadd.f32 %v4633_v59, %v4521_v48 }
 0x1e1   :  { %3441 = vmatprep.subr.mxu1 %v5310_v50  ;;  %2225 = vmatprep.mubr.f32.mxu0 %v2148_v42  ;;  %v4775_v32 = vadd.f32 %v1545_v53, %v1441_v46  ;;  %v1431_v47 = vpop.f32.mrf.mxu0  ;;  %v978_v53 = vadd.f32 %v4641_v28, %v4530_v54 }
 0x1e2   :  { %3376 = vmatpush3.msra.mxu0 %v4343_v9  ;;  %3442 = vmatpush3.msra.mxu1 %v5312_v22  ;;  %v1547_v49 = vpop.f32.mrf.mxu1  ;;  %v4795_v46 = vadd.f32 %v1543_v61, %v1440_v62 }
 0x1e3   :  { %5340 = vst [vmem:[#allocation5_spill] sm:$0xff] %v4775_v32  ;;  %3377 = vmatprep.subr.mxu0 %v4353_v11  ;;  %3443 = vmatprep.subr.mxu1 %v5315_v60  ;;  %v2411_v42 = vmul.f32 %v4775_v32, %v4775_v32  ;;  %v1443_v54 = vadd.f32 %v1427_v30, %v978_v53  ;;  %v1433_v55 = vpop.f32.mrf.mxu0 }
 0x1e4   :  { %3378 = vmatpush3.msra.mxu0 %v4351_v10  ;;  %3444 = vmatpush3.msra.mxu1 %v5317_v2  ;;  %v1549_v4 = vpop.f32.mrf.mxu1  ;;  %5342 = vst [vmem:[#allocation27_spill] sm:$0xff] %v4795_v46  ;;  %v984_v30 = vadd.f32 %v4662_v23, %v4556_v13  ;;  %v1442_v53 = vadd.f32 %v1425_v15, %v976_v36 }
 0x1e5   :  { %2226 = vmatmul.mubr.f32.gmra.mxu0 %v2147_v57  ;;  %3379 = vmatprep.subr.mxu0 %v4361_v26  ;;  %v2149_v57 = vmul.f32 %v4664_v27, %v4664_v27  ;;  %v2410_v48 = vmul.f32 %v4795_v46, %v4795_v46  ;;  %v1435_v59 = vpop.f32.mrf.mxu0  ;;  %v982_v15 = vadd.f32 %v4653_v56, %v4543_v45 }
 0x1e6   :  { %3445 = vmatprep.subr.mxu1 %v5320_v16  ;;  %2230 = vmatprep.mubr.f32.mxu0 %v2150_v19  ;;  %v1553_v28 = vpop.f32.mrf.mxu1  ;;  %v4805_v19 = vadd.f32 %v1549_v4, %v1443_v54  ;;  %v4816_v62 = vadd.f32 %v1547_v49, %v1442_v53  ;;  %v1445_v4 = vadd.f32 %v1433_v55, %v984_v30 }
 0x1e7   :  { %3380 = vmatpush3.msra.mxu0 %v4359_v25  ;;  %3446 = vmatpush3.msra.mxu1 %v5322_v20  ;;  %v1437_v49 = vpop.f32.mrf.mxu0  ;;  %v988_v54 = vadd.f32 %v4681_v51, %v4578_v0  ;;  %v1444_v55 = vadd.f32 %v1431_v47, %v982_v15  ;;  %v5347_v51 = vld [vmem:[#allocation36_spill] sm:$0xff] }
 0x1e8   :  { %3381 = vmatprep.subr.mxu0 %v4373_v29  ;;  %3503 = vmatprep.subr.mxu1 %v5324_v58  ;;  %5343 = vst [vmem:[#allocation25_spill] sm:$0xff] %v4805_v19  ;;  %v1555_v61 = vpop.f32.mrf.mxu1  ;;  %5344 = vst [vmem:[#allocation39_spill] sm:$0xff] %v4816_v62  ;;  %v2413_v13 = vmul.f32 %v4805_v19, %v4805_v19  ;;  %v2412_v45 = vmul.f32 %v4816_v62, %v4816_v62 }
 0x1e9   :  { %3382 = vmatpush3.msra.mxu0 %v4371_v14  ;;  %2482 = vmatprep.mubr.f32.mxu1 %v2411_v42  ;;  %v4826_v42 = vadd.f32 %v1555_v61, %v1445_v4  ;;  %v4837_v36 = vadd.f32 %v1553_v28, %v1444_v55  ;;  %v986_v47 = vadd.f32 %v4671_v43, %v5347_v51  ;;  %v4857_v43 = vpop.f32.mrf.mxu0  ;;  %v5356_v51 = vld [vmem:[#allocation9_spill] sm:$0xff] }
 0x1ea   :  { %2231 = vmatmul.mubr.f32.gmra.mxu0 %v2149_v57  ;;  %3383 = vmatprep.subr.mxu0 %v4385_v33  ;;  %v1557_v23 = vpop.f32.mrf.mxu1  ;;  %v1447_v57 = vadd.f32 %v1437_v49, %v988_v54  ;;  %v1310_v49 = vadd.f32 %v4667_v52, %v4694_v41 }
 0x1eb   :  { %3384 = vmatpush3.msra.mxu0 %v4381_v31  ;;  %2385 = vmatprep.mubr.f32.mxu0 %v4775_v32  ;;  %5345 = vst [vmem:[#allocation40_spill] sm:$0xff] %v4826_v42  ;;  %5346 = vst [vmem:[#allocation41_spill] sm:$0xff] %v4837_v36  ;;  %v2415_v0 = vmul.f32 %v4826_v42, %v4826_v42  ;;  %v1446_v61 = vadd.f32 %v1435_v59, %v986_v47  ;;  %v1626_v4 = vpop.f32.mrf.mxu0 }
 0x1ec   :  { %3385 = vmatprep.subr.mxu0 %v4395_v35  ;;  %2483 = vmatmul.mubr.f32.vlgmr.msra.gmra.mxu1 %v2410_v48  ;;  %v1559_v56 = vpop.f32.mrf.mxu1  ;;  %v2414_v30 = vmul.f32 %v4837_v36, %v4837_v36  ;;  %v1644_v55 = vadd.f32 %v1626_v4, %v1310_v49 }
 0x1ed   :  { %3386 = vmatpush3.msra.mxu0 %v4391_v34  ;;  %3504 = vmatpush3.msra.mxu1 %v4328_v6  ;;  %v4848_v28 = vadd.f32 %v1559_v56, %v1447_v57  ;;  %v4859_v53 = vadd.f32 %v1557_v23, %v1446_v61  ;;  %v1628_v15 = vpop.f32.mrf.mxu0 }
 0x1ee   :  { %3387 = vmatprep.subr.mxu0 %v4405_v38  ;;  %3505 = vmatprep.subr.mxu1 %v4337_v8 }
 0x1ef   :  { %3388 = vmatpush3.msra.mxu0 %v4403_v37  ;;  %3506 = vmatpush3.msra.mxu1 %v4335_v7  ;;  %5348 = vst [vmem:[#allocation36_spill] sm:$0xff] %v4848_v28  ;;  %5349 = vst [vmem:[#allocation42_spill] sm:$0xff] %v4859_v53  ;;  %v2417_v48 = vmul.f32 %v4848_v28, %v4848_v28 }
 0x1f0   :  { %3389 = vmatprep.subr.mxu0 %v4415_v40  ;;  %2487 = vmatprep.mubr.f32.mxu1 %v2413_v13  ;;  %v2416_v13 = vmul.f32 %v4859_v53, %v4859_v53 }
 0x1f1   :  { %3390 = vmatpush3.msra.mxu0 %v4413_v39  ;;  %3507 = vmatprep.subr.mxu1 %v4345_v24 }
 0x1f2   :  { %3391 = vmatprep.subr.mxu0 %v4425_v44  ;;  %2488 = vmatmul.mubr.f32.gmra.mxu1 %v2412_v45  ;;  %v5354_v45 = vld [vmem:[#allocation13_spill] sm:$0xff] }
 0x1f3   :  { %3392 = vmatpush3.msra.mxu0 %v5299_v17  ;;  %3508 = vmatpush3.msra.mxu1 %v4343_v9 }
 0x1f4   :  { %3393 = vmatprep.subr.mxu0 %v5300_v12  ;;  %3509 = vmatprep.subr.mxu1 %v4353_v11 }
 0x1f5   :  { %3394 = vmatpush3.msra.mxu0 %v5304_v21  ;;  %3510 = vmatpush3.msra.mxu1 %v4351_v10 }
 0x1f6   :  { %3395 = vmatprep.subr.mxu0 %v5305_v1  ;;  %2492 = vmatprep.mubr.f32.mxu1 %v2415_v0  ;;  %v4868_v59 = vpop.f32.mrf.mxu1 }
 0x1f7   :  { %3396 = vmatpush3.msra.mxu0 %v5307_v63  ;;  %3511 = vmatprep.subr.mxu1 %v4361_v26 }
 0x1f8   :  { %3397 = vmatprep.subr.mxu0 %v5310_v50  ;;  %2493 = vmatmul.mubr.f32.gmra.mxu1 %v2414_v30  ;;  %v1748_v23 = vpop.f32.mrf.mxu1 }
 0x1f9   :  { %3398 = vmatpush3.msra.mxu0 %v5312_v22  ;;  %3512 = vmatpush3.msra.mxu1 %v4359_v25 }
 0x1fa   :  { %3399 = vmatprep.subr.mxu0 %v5315_v60  ;;  %3513 = vmatprep.subr.mxu1 %v4373_v29  ;;  %v1750_v54 = vpop.f32.mrf.mxu1 }
 0x1fb   :  { %3400 = vmatpush3.msra.mxu0 %v5317_v2  ;;  %3514 = vmatpush3.msra.mxu1 %v4371_v14 }
 0x1fc   :  { %3401 = vmatprep.subr.mxu0 %v5320_v16  ;;  %2497 = vmatprep.mubr.f32.mxu1 %v2417_v48 }
 0x1fd   :  { %3515 = vmatprep.subr.mxu1 %v4385_v33  ;;  %3402 = vmatpush3.msra.mxu0 %v5322_v20 }
 0x1fe   :  { %2498 = vmatmul.mubr.f32.gmra.mxu1 %v2416_v13  ;;  %2386 = vmatmul.mubr.f32.vlgmr.msra.gmra.mxu0 %v4795_v46 }
 0x1ff   :  { %3516 = vmatpush3.msra.mxu1 %v4381_v31  ;;  %3459 = vmatprep.subr.mxu0 %v5324_v58  ;;  %v1630_v58 = vpop.f32.mrf.mxu0 }
 0x200   :  { %3517 = vmatprep.subr.mxu1 %v4395_v35  ;;  %2390 = vmatprep.mubr.f32.mxu0 %v4805_v19 }
 0x201   :  { %3460 = vmatpush3.msra.mxu0 %v4328_v6  ;;  %3518 = vmatpush3.msra.mxu1 %v4391_v34  ;;  %v4893_v6 = vadd.f32 %v1748_v23, %v1644_v55  ;;  %v5362_v23 = vld [vmem:[#allocation26_spill] sm:$0xff] }
 0x202   :  { %3461 = vmatprep.subr.mxu0 %v4337_v8  ;;  %3519 = vmatprep.subr.mxu1 %v4405_v38  ;;  %v1752_v8 = vpop.f32.mrf.mxu1 }
 0x203   :  { %3462 = vmatpush3.msra.mxu0 %v4335_v7  ;;  %3520 = vmatpush3.msra.mxu1 %v4403_v37  ;;  %5350 = vst [vmem:[#allocation43_spill] sm:$0xff] %v4893_v6  ;;  %v1634_v7 = vpop.f32.mrf.mxu0 }
 0x204   :  { %2391 = vmatmul.mubr.f32.gmra.mxu0 %v4816_v62  ;;  %3463 = vmatprep.subr.mxu0 %v4345_v24  ;;  %v2597_v24 = vmul.f32 %v4893_v6, %v4893_v6 }
 0x205   :  { %3521 = vmatprep.subr.mxu1 %v4415_v40  ;;  %2395 = vmatprep.mubr.f32.mxu0 %v4826_v42  ;;  %v1636_v52 = vpop.f32.mrf.mxu0 }
 0x206   :  { %3464 = vmatpush3.msra.mxu0 %v4343_v9  ;;  %3522 = vmatpush3.msra.mxu1 %v4413_v39  ;;  %v1756_v9 = vpop.f32.mrf.mxu1 }
 0x207   :  { %3465 = vmatprep.subr.mxu0 %v4353_v11  ;;  %3523 = vmatprep.subr.mxu1 %v4425_v44  ;;  %v5351_v11 = vld [vmem:[#allocation22_spill] sm:$0xff]  ;;  %v1638_v61 = vpop.f32.mrf.mxu0 }
 0x208   :  { %3466 = vmatpush3.msra.mxu0 %v4351_v10  ;;  %3524 = vmatpush3.msra.mxu1 %v5299_v17  ;;  %v5352_v10 = vld [vmem:[#allocation7_spill] sm:$0xff] }
 0x209   :  { %2396 = vmatmul.mubr.f32.gmra.mxu0 %v4837_v36  ;;  %3467 = vmatprep.subr.mxu0 %v4361_v26  ;;  %v1308_v41 = vadd.f32 %v5352_v10, %v5351_v11  ;;  %v5353_v26 = vld [vmem:[#allocation12_spill] sm:$0xff] }
 0x20a   :  { %3525 = vmatprep.subr.mxu1 %v5300_v12  ;;  %2400 = vmatprep.mubr.f32.mxu0 %v4848_v28  ;;  %v1314_v56 = vadd.f32 %v5354_v45, %v5353_v26 }
 0x20b   :  { %3468 = vmatpush3.msra.mxu0 %v4359_v25  ;;  %3526 = vmatpush3.msra.mxu1 %v5304_v21  ;;  %v1643_v57 = vadd.f32 %v4857_v43, %v1308_v41  ;;  %v1758_v25 = vpop.f32.mrf.mxu1  ;;  %v5359_v43 = vld [vmem:[#allocation16_spill] sm:$0xff]  ;;  %v5368_v41 = vld [vmem:[#allocation21_spill] sm:$0xff] }
 0x20c   :  { %3469 = vmatprep.subr.mxu0 %v4373_v29  ;;  %3527 = vmatprep.subr.mxu1 %v5305_v1  ;;  %v1646_v0 = vadd.f32 %v1630_v58, %v1314_v56  ;;  %v5355_v29 = vld [vmem:[#allocation14_spill] sm:$0xff]  ;;  %v1640_v58 = vpop.f32.mrf.mxu0 }
 0x20d   :  { %2668 = vmatprep.mubr.f32.mxu1 %v2597_v24  ;;  %3470 = vmatpush3.msra.mxu0 %v4371_v14  ;;  %v1312_v47 = vadd.f32 %v5356_v51, %v5355_v29  ;;  %v4925_v30 = vadd.f32 %v4868_v59, %v1643_v57  ;;  %v5358_v14 = vld [vmem:[#allocation18_spill] sm:$0xff]  ;;  %v1760_v13 = vpop.f32.mrf.mxu1 }
 0x20e   :  { %3528 = vmatpush3.msra.mxu1 %v5307_v63  ;;  %2401 = vmatmul.mubr.f32.gmra.mxu0 %v4859_v53  ;;  %v1320_v48 = vadd.f32 %v5359_v43, %v5358_v14  ;;  %v4931_v4 = vadd.f32 %v1752_v8, %v1646_v0 }
 0x20f   :  { %3471 = vmatprep.subr.mxu0 %v4385_v33  ;;  %3529 = vmatprep.subr.mxu1 %v5310_v50  ;;  %5357 = vst [vmem:[#allocation22_spill] sm:$0xff] %v4925_v30  ;;  %v1645_v33 = vadd.f32 %v1628_v15, %v1312_v47  ;;  %v2596_v55 = vmul.f32 %v4925_v30, %v4925_v30  ;;  %v1762_v10 = vpop.f32.mrf.mxu1 }
 0x210   :  { %3472 = vmatpush3.msra.mxu0 %v4381_v31  ;;  %2571 = vmatprep.mubr.f32.mxu0 %v4893_v6  ;;  %5360 = vst [vmem:[#allocation7_spill] sm:$0xff] %v4931_v4  ;;  %v1648_v59 = vadd.f32 %v1636_v52, %v1320_v48  ;;  %v5361_v31 = vld [vmem:[#allocation19_spill] sm:$0xff] }
 0x211   :  { %3530 = vmatpush3.msra.mxu1 %v5312_v22  ;;  %3473 = vmatprep.subr.mxu0 %v4395_v35  ;;  %v1318_v49 = vadd.f32 %v5362_v23, %v5361_v31  ;;  %v4943_v8 = vadd.f32 %v1750_v54, %v1645_v33  ;;  %v5364_v35 = vld [vmem:[#allocation17_spill] sm:$0xff] }
 0x212   :  { %3531 = vmatprep.subr.mxu1 %v5315_v60  ;;  %3474 = vmatpush3.msra.mxu0 %v4391_v34  ;;  %v5365_v34 = vld [vmem:[#allocation20_spill] sm:$0xff]  ;;  %v4949_v24 = vadd.f32 %v1758_v25, %v1648_v59 }
 0x213   :  { %3532 = vmatpush3.msra.mxu1 %v5317_v2  ;;  %3475 = vmatprep.subr.mxu0 %v4405_v38  ;;  %5363 = vst [vmem:[#allocation12_spill] sm:$0xff] %v4943_v8  ;;  %v1324_v15 = vadd.f32 %v5365_v34, %v5364_v35  ;;  %v2599_v38 = vmul.f32 %v4931_v4, %v4931_v4 }
 0x214   :  { %3533 = vmatprep.subr.mxu1 %v5320_v16  ;;  %3476 = vmatpush3.msra.mxu0 %v4403_v37  ;;  %5366 = vst [vmem:[#allocation13_spill] sm:$0xff] %v4949_v24  ;;  %v1647_v11 = vadd.f32 %v1634_v7, %v1318_v49  ;;  %v5367_v37 = vld [vmem:[#allocation24_spill] sm:$0xff] }
 0x215   :  { %3534 = vmatpush3.msra.mxu1 %v5322_v20  ;;  %3477 = vmatprep.subr.mxu0 %v4415_v40  ;;  %v1650_v54 = vadd.f32 %v1640_v58, %v1324_v15  ;;  %v1322_v52 = vadd.f32 %v5368_v41, %v5367_v37  ;;  %v2598_v40 = vmul.f32 %v4943_v8, %v4943_v8 }
 0x216   :  { %2669 = vmatmul.mubr.f32.vlgmr.msra.gmra.mxu1 %v2596_v55  ;;  %3478 = vmatpush3.msra.mxu0 %v4413_v39  ;;  %v4959_v26 = vadd.f32 %v1756_v9, %v1647_v11  ;;  %v2601_v39 = vmul.f32 %v4949_v24, %v4949_v24 }
 0x217   :  { %2673 = vmatprep.mubr.f32.mxu1 %v2599_v38  ;;  %3479 = vmatprep.subr.mxu0 %v4425_v44  ;;  %v4964_v45 = vadd.f32 %v1762_v10, %v1650_v54  ;;  %v1649_v7 = vadd.f32 %v1638_v61, %v1322_v52 }
 0x218   :  { %5369 = vst [vmem:[#allocation14_spill] sm:$0xff] %v4959_v26  ;;  %3480 = vmatpush3.msra.mxu0 %v5299_v17  ;;  %v2600_v17 = vmul.f32 %v4959_v26, %v4959_v26 }
 0x219   :  { %5370 = vst [vmem:[#allocation9_spill] sm:$0xff] %v4964_v45  ;;  %3481 = vmatprep.subr.mxu0 %v5300_v12  ;;  %v4971_v44 = vadd.f32 %v1760_v13, %v1649_v7  ;;  %v2603_v12 = vmul.f32 %v4964_v45, %v4964_v45 }
 0x21a   :  { %2674 = vmatmul.mubr.f32.gmra.mxu1 %v2598_v40  ;;  %3482 = vmatpush3.msra.mxu0 %v5304_v21 }
 0x21b   :  { %2678 = vmatprep.mubr.f32.mxu1 %v2601_v39  ;;  %3483 = vmatprep.subr.mxu0 %v5305_v1  ;;  %5371 = vst [vmem:[#allocation18_spill] sm:$0xff] %v4971_v44  ;;  %v2602_v21 = vmul.f32 %v4971_v44, %v4971_v44  ;;  %v5372_v1 = vmov 0  }
 0x21c   :  { %3484 = vmatpush3.msra.mxu0 %v5307_v63 }
 0x21d   :  { %3485 = vmatprep.subr.mxu0 %v5310_v50 }
 0x21e   :  { %2679 = vmatmul.mubr.f32.gmra.mxu1 %v2600_v17  ;;  %3486 = vmatpush3.msra.mxu0 %v5312_v22 }
 0x21f   :  { %2683 = vmatprep.mubr.f32.mxu1 %v2603_v12  ;;  %3487 = vmatprep.subr.mxu0 %v5315_v60 }
 0x220   :  { %3488 = vmatpush3.msra.mxu0 %v5317_v2 }
 0x221   :  { %3489 = vmatprep.subr.mxu0 %v5320_v16 }
 0x222   :  { %2684 = vmatmul.mubr.f32.gmra.mxu1 %v2602_v21  ;;  %3490 = vmatpush3.msra.mxu0 %v5322_v20 }
 0x223   :  { %2572 = vmatmul.mubr.f32.vlgmr.msra.gmra.mxu0 %v4925_v30  ;;  %2923 = vmatprep.mubr.bf16.mxu1 %v5372_v1 }
 0x224   :  { %2576 = vmatprep.mubr.f32.mxu0 %v4931_v4 }
 0x227   :  { %2577 = vmatmul.mubr.f32.gmra.mxu0 %v4943_v8 }
 0x228   :  { %2581 = vmatprep.mubr.f32.mxu0 %v4949_v24 }
 0x22b   :  { %2582 = vmatmul.mubr.f32.gmra.mxu0 %v4959_v26 }
 0x22c   :  { %2586 = vmatprep.mubr.f32.mxu0 %v4964_v45 }
 0x22f   :  { %2587 = vmatmul.mubr.f32.gmra.mxu0 %v4971_v44 }
 0x230   :  { %2852 = vmatprep.mubr.bf16.mxu0 %v5372_v1 }
 0x25e   :  { %v3271_v63 = vpop.f32.mrf.mxu1 }
 0x260   :  { %v3272_v50 = vpop.f32.mrf.mxu1 }
 0x261   :  { %v3273_v42 = vadd.f32 %v3272_v50, %v3271_v63 }
 0x262   :  { %v4995_v22 = vpop.f32.mrf.mxu1 }
 0x264   :  { %v4997_v60 = vpop.f32.mrf.mxu1 }
 0x266   :  { %v4999_v16 = vpop.f32.mrf.mxu1 }
 0x268   :  { %v5001_v9 = vpop.f32.mrf.mxu1 }
 0x26a   :  { %v5003_v57 = vpop.f32.mrf.mxu1 }
 0x26c   :  { %v5005_v0 = vpop.f32.mrf.mxu1 }
 0x274   :  { %v3227_v2 = vpop.f32.mrf.mxu0 }
 0x276   :  { %v3228_v20 = vpop.f32.mrf.mxu0 }
 0x277   :  { %v3229_v18 = vadd.f32 %v3228_v20, %v3227_v2 }
 0x279   :  { %v3230_v56 = vpop.f32.mrf.mxu0  ;;  %v2125_v46 = vadd.f32 %v3273_v42, %v3229_v18  ;;  %v3282_v18 = vadd.f32 %v5005_v0, %v5003_v57 }
 0x27b   :  { %v3231_v25 = vpop.f32.mrf.mxu0 }
 0x27c   :  { %v3232_v6 = vadd.f32 %v3231_v25, %v3230_v56 }
 0x27e   :  { %v3233_v29 = vpop.f32.mrf.mxu0 }
 0x280   :  { %v3359_v51 = vpop.f32.mrf.mxu1  ;;  %v3234_v47 = vpop.f32.mrf.mxu0 }
 0x282   :  { %v3360_v61 = vpop.f32.mrf.mxu1 }
 0x283   :  { %v3361_v5 = vadd.f32 %v3360_v61, %v3359_v51  ;;  %v3279_v51 = vadd.f32 %v5001_v9, %v4999_v16 }
 0x284   :  { %v5007_v14 = vpop.f32.mrf.mxu0 }
 0x286   :  { %v5009_v48 = vpop.f32.mrf.mxu0 }
 0x287   :  { %v3362_v43 = vpop.f32.mrf.mxu1 }
 0x289   :  { %v3363_v33 = vpop.f32.mrf.mxu1 }
 0x28c   :  { %v5011_v59 = vpop.f32.mrf.mxu1 }
 0x28e   :  { %v5013_v23 = vpop.f32.mrf.mxu1 }
 0x291   :  { %v5015_v55 = vpop.f32.mrf.mxu1 }
 0x292   :  { %5373 = vst [vmem:[#allocation16_spill] sm:$0xff] %v5015_v55  ;;  %v3235_v55 = vadd.f32 %v3234_v47, %v3233_v29 }
 0x293   :  { %v5017_v35 = vpop.f32.mrf.mxu1 }
 0x294   :  { %5374 = vst [vmem:[#allocation19_spill] sm:$0xff] %v5017_v35  ;;  %v3276_v35 = vadd.f32 %v4997_v60, %v4995_v22  ;;  %v2135_v25 = vadd.f32 %v3279_v51, %v3235_v55 }
 0x29b   :  { %v3315_v13 = vpop.f32.mrf.mxu0 }
 0x29d   :  { %v3316_v31 = vpop.f32.mrf.mxu0 }
 0x29e   :  { %v3317_v26 = vadd.f32 %v3316_v31, %v3315_v13 }
 0x2a0   :  { %v3318_v49 = vpop.f32.mrf.mxu0  ;;  %v2303_v32 = vadd.f32 %v3361_v5, %v3317_v26  ;;  %v2130_v26 = vadd.f32 %v3276_v35, %v3232_v6 }
 0x2a2   :  { %v3319_v58 = vpop.f32.mrf.mxu0 }
 0x2a3   :  { %v3320_v19 = vadd.f32 %v3319_v58, %v3318_v49 }
 0x2a5   :  { %v3321_v34 = vpop.f32.mrf.mxu0 }
 0x2a7   :  { %v3322_v38 = vpop.f32.mrf.mxu0 }
 0x2aa   :  { %v5019_v10 = vpop.f32.mrf.mxu0 }
 0x2ab   :  { %5375 = vst [vmem:[#allocation26_spill] sm:$0xff] %v5019_v10  ;;  %v3364_v10 = vadd.f32 %v3363_v33, %v3362_v43 }
 0x2ac   :  { %v3447_v15 = vpop.f32.mrf.mxu1  ;;  %v3325_v37 = vpop.f32.mrf.mxu0 }
 0x2ad   :  { %v2308_v5 = vadd.f32 %v3364_v10, %v3320_v19  ;;  %v3238_v19 = vadd.f32 %v5009_v48, %v5007_v14 }
 0x2ae   :  { %v3448_v11 = vpop.f32.mrf.mxu1 }
 0x2af   :  { %v3449_v3 = vadd.f32 %v3448_v11, %v3447_v15 }
 0x2b1   :  { %v2503_v13 = vadd.f32 %v3449_v3, %v2303_v32  ;;  %v3367_v32 = vadd.f32 %v5013_v23, %v5011_v59  ;;  %v5379_v59 = vld [vmem:[#allocation16_spill] sm:$0xff] }
 0x2b2   :  { %v3450_v54 = vpop.f32.mrf.mxu1 }
 0x2b4   :  { %v3451_v41 = vpop.f32.mrf.mxu1 }
 0x2b5   :  { %v3452_v2 = vadd.f32 %v3451_v41, %v3450_v54 }
 0x2b7   :  { %v2504_v3 = vadd.f32 %v3452_v2, %v2308_v5 }
 0x2b8   :  { %v3453_v40 = vpop.f32.mrf.mxu1 }
 0x2ba   :  { %v3454_v7 = vpop.f32.mrf.mxu1 }
 0x2be   :  { %v3403_v52 = vpop.f32.mrf.mxu0  ;;  %v5021_v12 = vpop.f32.mrf.mxu1 }
 0x2bf   :  { %5376 = vst [vmem:[#allocation17_spill] sm:$0xff] %v5021_v12 }
 0x2c0   :  { %v3404_v39 = vpop.f32.mrf.mxu0  ;;  %v5023_v1 = vpop.f32.mrf.mxu1 }
 0x2c1   :  { %5377 = vst [vmem:[#allocation20_spill] sm:$0xff] %v5023_v1  ;;  %v3405_v4 = vadd.f32 %v3404_v39, %v3403_v52 }
 0x2c3   :  { %v2406_v31 = vadd.f32 %v3405_v4, %v2125_v46  ;;  %v3455_v46 = vadd.f32 %v3454_v7, %v3453_v40 }
 0x2c4   :  { %v3406_v17 = vpop.f32.mrf.mxu0 }
 0x2c6   :  { %v3407_v21 = vpop.f32.mrf.mxu0  ;;  %v5381_v49 = vld [vmem:[#allocation17_spill] sm:$0xff] }
 0x2c7   :  { %v3408_v63 = vadd.f32 %v3407_v21, %v3406_v17 }
 0x2c8   :  { %v5382_v55 = vld [vmem:[#allocation20_spill] sm:$0xff] }
 0x2c9   :  { %v3409_v8 = vpop.f32.mrf.mxu0  ;;  %v2407_v4 = vadd.f32 %v3408_v63, %v2130_v26  ;;  %v3458_v58 = vadd.f32 %v5382_v55, %v5381_v49 }
 0x2cb   :  { %v3410_v53 = vpop.f32.mrf.mxu0 }
 0x2cc   :  { %v3411_v16 = vadd.f32 %v3410_v53, %v3409_v8  ;;  %v5380_v53 = vld [vmem:[#allocation19_spill] sm:$0xff] }
 0x2cd   :  { %v3370_v8 = vadd.f32 %v5380_v53, %v5379_v59 }
 0x2ce   :  { %v3412_v27 = vpop.f32.mrf.mxu0  ;;  %v2408_v35 = vadd.f32 %v3411_v16, %v2135_v25  ;;  %v2713_v25 = vld [vmem:[%s5200_s3] sm:$0xff]  ;;  %v2715_v16 = vld [vmem:[%s5200_s3 + $0x10] sm:$0xff] }
 0x2d0   :  { %v3413_v24 = vpop.f32.mrf.mxu0 }
 0x2d1   :  { %v3414_v14 = vadd.f32 %v3413_v24, %v3412_v27 }
 0x2d6   :  { %v3535_v44 = vpop.f32.mrf.mxu1 }
 0x2d8   :  { %v3536_v62 = vpop.f32.mrf.mxu1 }
 0x2d9   :  { %v3537_v1 = vadd.f32 %v3536_v62, %v3535_v44  ;;  %v3323_v62 = vadd.f32 %v3322_v38, %v3321_v34  ;;  %v2140_v38 = vadd.f32 %v3282_v18, %v3238_v19 }
 0x2da   :  { %v3538_v45 = vpop.f32.mrf.mxu1 }
 0x2db   :  { %v2689_v44 = vadd.f32 %v3537_v1, %v2503_v13  ;;  %v2313_v6 = vadd.f32 %v3367_v32, %v3323_v62  ;;  %v5378_v1 = vld [vmem:[#allocation26_spill] sm:$0xff]  ;;  %v2409_v17 = vadd.f32 %v3414_v14, %v2140_v38  ;;  %v5383_v14 = vld [vmem:[#allocation28_spill] sm:$0xff] }
 0x2dc   :  { %v3539_v28 = vpop.f32.mrf.mxu1 }
 0x2dd   :  { %v3540_v22 = vadd.f32 %v3539_v28, %v3538_v45  ;;  %v3326_v28 = vadd.f32 %v3325_v37, %v5378_v1  ;;  %v2697_v29 = vmul.f32 0.001953125, %v2689_v44  ;;  %v2505_v23 = vadd.f32 %v3455_v46, %v2313_v6  ;;  %v2714_v46 = vld [vmem:[%s5200_s3 + $0x8] sm:$0xff]  ;;  %v2731_v6 = vld [vmem:[%s5201_s4 + $0x10] sm:$0xff]  ;;  %v2716_v1 = vld [vmem:[%s5200_s3 + $0x18] sm:$0xff] }
 0x2de   :  { %v3541_v36 = vpop.f32.mrf.mxu1 }
 0x2df   :  { %v2690_v47 = vadd.f32 %v3540_v22, %v2504_v3  ;;  %v2318_v11 = vadd.f32 %v3370_v8, %v3326_v28 }
 0x2e0   :  { %v3542_v12 = vpop.f32.mrf.mxu1 }
 0x2e1   :  { %v3543_v45 = vadd.f32 %v3542_v12, %v3541_v36  ;;  %v2698_v41 = vmul.f32 0.001953125, %v2690_v47  ;;  %v2506_v7 = vadd.f32 %v3458_v58, %v2318_v11  ;;  %v5386_v11 = vld [vmem:[#allocation38_spill] sm:$0xff] }
 0x2e2   :  { %v3544_v60 = vpop.f32.mrf.mxu1 }
 0x2e3   :  { %v3491_v30 = vpop.f32.mrf.mxu0  ;;  %v2691_v10 = vadd.f32 %v3543_v45, %v2505_v23  ;;  %v2742_v23 = vld [vmem:[%s5203_s6] sm:$0xff] }
 0x2e4   :  { %v3545_v61 = vpop.f32.mrf.mxu1 }
 0x2e5   :  { %v3492_v20 = vpop.f32.mrf.mxu0  ;;  %v3546_v54 = vadd.f32 %v3545_v61, %v3544_v60  ;;  %v2729_v61 = vld [vmem:[%s5201_s4] sm:$0xff] }
 0x2e6   :  { %v3493_v50 = vadd.f32 %v3492_v20, %v3491_v30  ;;  %v2699_v20 = vmul.f32 0.001953125, %v2691_v10 }
 0x2e7   :  { %v3494_v42 = vpop.f32.mrf.mxu0  ;;  %v2692_v13 = vadd.f32 %v3546_v54, %v2506_v7  ;;  %v5387_v54 = vld [vmem:[#allocation5_spill] sm:$0xff]  ;;  %v5390_v7 = vld [vmem:[#allocation10_spill] sm:$0xff] }
 0x2e8   :  { %v2592_v56 = vadd.f32 %v3493_v50, %v2406_v31 }
 0x2e9   :  { %v3495_v30 = vpop.f32.mrf.mxu0  ;;  %v2700_v62 = vmul.f32 0.001953125, %v2692_v13  ;;  %v5394_v13 = vld [vmem:[#allocation6_spill] sm:$0xff] }
 0x2ea   :  { %v5033_v9 = vmul.f32 0.001953125, %v2592_v56  ;;  %v3496_v57 = vadd.f32 %v3495_v30, %v3494_v42 }
 0x2eb   :  { %v3497_v0 = vpop.f32.mrf.mxu0 }
 0x2ec   :  { %v2701_v43 = vmul.f32 %v5033_v9, %v5033_v9  ;;  %v2593_v33 = vadd.f32 %v3496_v57, %v2407_v4 }
 0x2ed   :  { %v3498_v48 = vpop.f32.mrf.mxu0 }
 0x2ee   :  { %v2705_v34 = vsub.f32 %v2697_v29, %v2701_v43  ;;  %v2694_v36 = vmul.f32 0.001953125, %v2593_v33  ;;  %v3499_v15 = vadd.f32 %v3498_v48, %v3497_v0  ;;  %v2732_v43 = vld [vmem:[%s5201_s4 + $0x18] sm:$0xff] }
 0x2ef   :  { %v3500_v37 = vpop.f32.mrf.mxu0 }
 0x2f0   :  { %v2709_v52 = vmax.f32 %v2705_v34, 0.0  ;;  %v2702_v40 = vmul.f32 %v2694_v36, %v2694_v36  ;;  %v2594_v39 = vadd.f32 %v3499_v15, %v2408_v35  ;;  %v5384_v35 = vld [vmem:[#allocation37_spill] sm:$0xff] }
 0x2f1   :  { %v3501_v12 = vpop.f32.mrf.mxu0  ;;  %v5385_v15 = vld [vmem:[#allocation29_spill] sm:$0xff] }
 0x2f2   :  { %v2717_v21 = vadd.f32 1e-05, %v2709_v52  ;;  %v2706_v2 = vsub.f32 %v2698_v41, %v2702_v40  ;;  %v2695_v27 = vmul.f32 0.001953125, %v2594_v39  ;;  %v3502_v24 = vadd.f32 %v3501_v12, %v3500_v37  ;;  %v5388_v41 = vld [vmem:[#allocation43_spill] sm:$0xff]  ;;  %v5389_v40 = vld [vmem:[#allocation30_spill] sm:$0xff] }
 0x2f3   :  { %v5391_v12 = vld [vmem:[#allocation27_spill] sm:$0xff] }
 0x2f4   :  { %3625 = vrsqrt.f32 %v2717_v21  ;;  %v2710_v31 = vmax.f32 %v2706_v2, 0.0  ;;  %v2703_v63 = vmul.f32 %v2695_v27, %v2695_v27  ;;  %v2595_v50 = vadd.f32 %v3502_v24, %v2409_v17  ;;  %v5392_v2 = vld [vmem:[#allocation22_spill] sm:$0xff]  ;;  %v5393_v24 = vld [vmem:[#allocation31_spill] sm:$0xff] }
 0x2f6   :  { %v2718_v51 = vadd.f32 1e-05, %v2710_v31  ;;  %v2707_v18 = vsub.f32 %v2699_v20, %v2703_v63  ;;  %v2696_v5 = vmul.f32 0.001953125, %v2595_v50  ;;  %v5395_v63 = vld [vmem:[#allocation25_spill] sm:$0xff] }
 0x2f8   :  { %3627 = vrsqrt.f32 %v2718_v51  ;;  %v2711_v42 = vmax.f32 %v2707_v18, 0.0  ;;  %v2704_v26 = vmul.f32 %v2696_v5, %v2696_v5  ;;  %v5396_v51 = vld [vmem:[#allocation7_spill] sm:$0xff] }
 0x2fa   :  { %v2719_v44 = vadd.f32 1e-05, %v2711_v42  ;;  %v2708_v22 = vsub.f32 %v2700_v62, %v2704_v26  ;;  %v5398_v42 = vld [vmem:[#allocation8_spill] sm:$0xff] }
 0x2fc   :  { %3629 = vrsqrt.f32 %v2719_v44  ;;  %v2712_v60 = vmax.f32 %v2708_v22, 0.0  ;;  %v5399_v44 = vld [vmem:[#allocation33_spill] sm:$0xff] }
 0x2fe   :  { %v2720_v56 = vadd.f32 1e-05, %v2712_v60  ;;  %v5400_v60 = vld [vmem:[#allocation23_spill] sm:$0xff] }
 0x300   :  { %3631 = vrsqrt.f32 %v2720_v56 }
 0x301   :  { %v3626_v32 = vpop.eup %3625 }
 0x302   :  { %v2725_v3 = vmul.f32 %v3626_v32, %v2713_v25 }
 0x304   :  { %2745 = vperm.xlu1 %3560, %v2725_v3   ;;  %v2733_v0 = vmul.f32 %v2725_v3, %v5033_v9  ;;  %v2730_v9 = vld [vmem:[%s5201_s4 + $0x8] sm:$0xff]  ;;  %v5401_v3 = vld [vmem:[#allocation40_spill] sm:$0xff] }
 0x305   :  { %v3628_v30 = vpop.eup %3627 }
 0x306   :  { %v2726_v4 = vmul.f32 %v3628_v30, %v2714_v46  ;;  %v2737_v59 = vsub.f32 %v2729_v61, %v2733_v0  ;;  %v5402_v30 = vld [vmem:[#allocation13_spill] sm:$0xff]  ;;  %v5406_v0 = vld [vmem:[#allocation15_spill] sm:$0xff] }
 0x307   :  { %v5407_v61 = vld [vmem:[#allocation35_spill] sm:$0xff] }
 0x308   :  { %2750 = vperm.xlu0 %3559, %v2726_v4   ;;  %v2734_v53 = vmul.f32 %v2726_v4, %v2694_v36 }
 0x309   :  { %v3630_v57 = vpop.eup %3629 }
 0x30a   :  { %v2727_v19 = vmul.f32 %v3630_v57, %v2715_v16  ;;  %v2738_v49 = vsub.f32 %v2730_v9, %v2734_v53  ;;  %v5403_v16 = vld [vmem:[#allocation41_spill] sm:$0xff] }
 0x30c   :  { %v2735_v28 = vmul.f32 %v2727_v19, %v2695_v27  ;;  %2755 = vperm.xlu1 %3560, %v2727_v19   ;;  %v5404_v19 = vld [vmem:[#allocation14_spill] sm:$0xff] }
 0x30d   :  { %v3632_v45 = vpop.eup %3631 }
 0x30e   :  { %v2739_v29 = vsub.f32 %v2731_v6, %v2735_v28  ;;  %v2728_v47 = vmul.f32 %v3632_v45, %v2716_v1  ;;  %v5405_v1 = vld [vmem:[#allocation34_spill] sm:$0xff] }
 0x310   :  { %v2736_v33 = vmul.f32 %v2728_v47, %v2696_v5  ;;  %2760 = vperm.xlu0 %3559, %v2728_v47   ;;  %2783 = vperm.xlu1 %3560, %v2739_v29   ;;  %v5397_v5 = vld [vmem:[#allocation32_spill] sm:$0xff] }
 0x312   :  { %v2740_v8 = vsub.f32 %v2732_v43, %v2736_v33 }
 0x314   :  { %2788 = vperm.xlu0 %3559, %v2740_v8   ;;  %2773 = vperm.xlu1 %3560, %v2737_v59   ;;  %v5408_v59 = vld [vmem:[#allocation11_spill] sm:$0xff] }
 0x318   :  { %2778 = vperm.xlu0 %3559, %v2738_v49   ;;  %2813 = vperm.xlu1 %3560, %v2742_v23   ;;  %v5409_v49 = vld [vmem:[#allocation36_spill] sm:$0xff] }
 0x37f   :  { %v2746_v55 = vpop.permute.xlu1 %2745 }
 0x380   :  { %v2764_v48 = vmul.f32 %v2746_v55, %v5383_v14  ;;  %v2864_v34 = vmul.f32 %v2746_v55, %v5384_v35  ;;  %v2763_v38 = vmul.f32 %v2746_v55, %v5385_v15  ;;  %v2863_v10 = vmul.f32 %v2746_v55, %v5386_v11 }
 0x381   :  { %v5079_v37 = vmul.f32 %v2746_v55, %v5387_v54  ;;  %v5082_v52 = vmul.f32 %v2746_v55, %v5388_v41  ;;  %v5089_v21 = vmul.f32 %v2746_v55, %v5391_v12  ;;  %v5092_v27 = vmul.f32 %v2746_v55, %v5392_v2  ;;  %v5410_v54 = vld [vmem:[#allocation9_spill] sm:$0xff] }
 0x383   :  { %v5072_v58 = vpop.permute.xlu0 %2750 }
 0x384   :  { %v2766_v39 = vmul.f32 %v5072_v58, %v5389_v40  ;;  %v2866_v17 = vmul.f32 %v5072_v58, %v5390_v7  ;;  %v2765_v20 = vmul.f32 %v5072_v58, %v5393_v24  ;;  %v2865_v31 = vmul.f32 %v5072_v58, %v5394_v13 }
 0x385   :  { %v5100_v50 = vmul.f32 %v5072_v58, %v5395_v63  ;;  %v5104_v18 = vmul.f32 %v5072_v58, %v5396_v51 }
 0x387   :  { %v2756_v36 = vpop.permute.xlu1 %2755 }
 0x388   :  { %v2768_v62 = vmul.f32 %v2756_v36, %v5397_v5  ;;  %v2868_v26 = vmul.f32 %v2756_v36, %v5398_v42  ;;  %v2767_v22 = vmul.f32 %v2756_v36, %v5399_v44  ;;  %v2867_v56 = vmul.f32 %v2756_v36, %v5400_v60 }
 0x389   :  { %v2940_v46 = vmul.f32 %v2756_v36, %v5401_v3  ;;  %v3012_v4 = vmul.f32 %v2756_v36, %v5402_v30  ;;  %v2939_v57 = vmul.f32 %v2756_v36, %v5403_v16  ;;  %v5118_v6 = vmul.f32 %v2756_v36, %v5404_v19 }
 0x38b   :  { %v5110_v25 = vpop.permute.xlu0 %2760  ;;  %v5112_v32 = vpop.permute.xlu1 %2783 }
 0x38c   :  { %v2770_v28 = vmul.f32 %v5110_v25, %v5405_v1  ;;  %v2796_v45 = vadd.f32 %v5112_v32, %v2768_v62  ;;  %v2870_v29 = vmul.f32 %v5110_v25, %v5406_v0  ;;  %v2876_v47 = vadd.f32 %v2868_v26, %v5112_v32 }
 0x38d   :  { %v2769_v43 = vmul.f32 %v5110_v25, %v5407_v61  ;;  %v2795_v33 = vadd.f32 %v5112_v32, %v2767_v22  ;;  %v2869_v53 = vmul.f32 %v5110_v25, %v5408_v59  ;;  %v2875_v8 = vadd.f32 %v2867_v56, %v5112_v32 }
 0x38e   :  { %v2804_v9 = vmax.f32 %v2796_v45, 0.0  ;;  %v2884_v23 = vmax.f32 %v2876_v47, 0.0  ;;  %v2942_v55 = vmul.f32 %v5110_v25, %v5409_v49  ;;  %v2948_v14 = vadd.f32 %v2940_v46, %v5112_v32 }
 0x38f   :  { %v5135_v35 = vpop.permute.xlu0 %2788  ;;  %v5137_v36 = vpop.permute.xlu1 %2773  ;;  %v2803_v15 = vmax.f32 %v2795_v33, 0.0  ;;  %v2883_v11 = vmax.f32 %v2875_v8, 0.0  ;;  %v3014_v41 = vmul.f32 %v5110_v25, %v5410_v54  ;;  %v3020_v40 = vadd.f32 %v3012_v4, %v5112_v32  ;;  %v5411_v33 = vld [vmem:[#allocation42_spill] sm:$0xff] }
 0x390   :  { %v2798_v7 = vadd.f32 %v5135_v35, %v2770_v28  ;;  %v2878_v12 = vadd.f32 %v2870_v29, %v5135_v35  ;;  %v2797_v2 = vadd.f32 %v5135_v35, %v2769_v43  ;;  %v2877_v24 = vadd.f32 %v2869_v53, %v5135_v35  ;;  %v5413_v54 = vld [vmem:[#allocation18_spill] sm:$0xff] }
 0x391   :  { %v2792_v13 = vadd.f32 %v5137_v36, %v2764_v48  ;;  %v2872_v63 = vadd.f32 %v2864_v34, %v5137_v36  ;;  %v2791_v51 = vadd.f32 %v5137_v36, %v2763_v38  ;;  %v2871_v5 = vadd.f32 %v2863_v10, %v5137_v36 }
 0x392   :  { %v2806_v62 = vmax.f32 %v2798_v7, 0.0  ;;  %v2886_v42 = vmax.f32 %v2878_v12, 0.0  ;;  %v2805_v26 = vmax.f32 %v2797_v2, 0.0  ;;  %v2885_v44 = vmax.f32 %v2877_v24, 0.0  ;;  %v2741_v7 = vld [vmem:[%s5202_s5] sm:$0xf] }
 0x393   :  { %v5150_v22 = vpop.permute.xlu0 %2778  ;;  %v2800_v60 = vmax.f32 %v2792_v13, 0.0  ;;  %v2880_v56 = vmax.f32 %v2872_v63, 0.0  ;;  %v2799_v3 = vmax.f32 %v2791_v51, 0.0  ;;  %v2879_v46 = vmax.f32 %v2871_v5, 0.0  ;;  %s3664_s5 = smov [#allocation2]  }
 0x394   :  { %v2810_v30 = vpack.c.bf16 %v2806_v62, %v2804_v9  ;;  %v2890_v4 = vpack.c.bf16 %v2886_v42, %v2884_v23  ;;  %v2809_v16 = vpack.c.bf16 %v2805_v26, %v2803_v15  ;;  %v2889_v48 = vpack.c.bf16 %v2885_v44, %v2883_v11  ;;  %s3084_s0 = sshll.u32 %s3664_s5, 4  ;;  %s3085_s0 = int_to_ptr.vmem [resolvable:$true] %s3084_s0 }
 0x395   :  { %v2794_v34 = vadd.f32 %v5150_v22, %v2766_v39  ;;  %v2874_v38 = vadd.f32 %v2866_v17, %v5150_v22  ;;  %v2793_v10 = vadd.f32 %v5150_v22, %v2765_v20  ;;  %v2873_v19 = vadd.f32 %v2865_v31, %v5150_v22  ;;  %s3633_s9 = scalar_lea.vmem %s3085_s0, 1024  ;;  %p3638_p1 = scmp.lt.s32.totalorder %s3085_s0, %s3085_s0 }
 0x396   :  { %2832 = vmatprep.subr.bf16.mxu0 %v2810_v30  ;;  %2903 = vmatprep.subr.bf16.mxu1 %v2890_v4  ;;  %v2950_v1 = vadd.f32 %v2942_v55, %v5135_v35  ;;  %v2956_v28 = vmax.f32 %v2948_v14, 0.0  ;;  %v3022_v45 = vadd.f32 %v3014_v41, %v5135_v35  ;;  %v3028_v0 = vmax.f32 %v3020_v40, 0.0  ;;  %v5412_v14 = vld [vmem:[#allocation39_spill] sm:$0xff]  ;;  %p3634_p0 = scmp.ne.s32.totalorder %s3085_s0, %s3633_s9  ;;  %p3639_p2 = scmp.lt.s32.totalorder %s3633_s9, %s3633_s9 }
 0x397   :  { %2833 = vmatpush1.bf16.msra.mxu0 %v2809_v16  ;;  %2904 = vmatpush1.bf16.msra.mxu1 %v2889_v48  ;;  %v2802_v29 = vmax.f32 %v2794_v34, 0.0  ;;  %v2882_v47 = vmax.f32 %v2874_v38, 0.0  ;;  %v2801_v61 = vmax.f32 %v2793_v10, 0.0  ;;  %v2881_v39 = vmax.f32 %v2873_v19, 0.0 }
 0x398   :  { %v2958_v43 = vmax.f32 %v2950_v1, 0.0  ;;  %v3030_v17 = vmax.f32 %v3022_v45, 0.0  ;;  %v2941_v20 = vmul.f32 %v5110_v25, %v5411_v33  ;;  %v2947_v31 = vadd.f32 %v2939_v57, %v5112_v32  ;;  %p3640_p3 = por %p3639_p2, %p3638_p1 }
 0x399   :  { %v2808_v59 = vpack.c.bf16 %v2802_v29, %v2800_v60  ;;  %v2888_v53 = vpack.c.bf16 %v2882_v47, %v2880_v56  ;;  %v2807_v8 = vpack.c.bf16 %v2801_v61, %v2799_v3  ;;  %v2887_v9 = vpack.c.bf16 %v2881_v39, %v2879_v46 }
 0x39a   :  { %v2962_v23 = vpack.c.bf16 %v2958_v43, %v2956_v28  ;;  %v3034_v49 = vpack.c.bf16 %v3030_v17, %v3028_v0  ;;  %v2949_v55 = vadd.f32 %v2941_v20, %v5135_v35  ;;  %v2937_v15 = vmul.f32 %v5072_v58, %v5412_v14  ;;  %p3641_p4 = pnand %p3640_p3, %p3634_p0 }
 0x39b   :  { %2834 = vmatprep.subr.bf16.mxu0 %v2808_v59  ;;  %2905 = vmatprep.subr.bf16.mxu1 %v2888_v53  ;;  %v2955_v11 = vmax.f32 %v2947_v31, 0.0  ;;  %v3013_v41 = vmul.f32 %v5110_v25, %v5413_v54  ;;  %v3019_v57 = vadd.f32 %v5118_v6, %v5112_v32  ;;  %v2944_v40 = vadd.f32 %v5079_v37, %v5137_v36  ;;  %v5414_v6 = vld [vmem:[#allocation12_spill] sm:$0xff] }
 0x39c   :  { %2835 = vmatpush1.bf16.msra.mxu0 %v2807_v8  ;;  %2906 = vmatpush1.bf16.msra.mxu1 %v2887_v9  ;;  %v2957_v12 = vmax.f32 %v2949_v55, 0.0  ;;  %v2946_v2 = vadd.f32 %v5100_v50, %v5150_v22  ;;  %v3016_v24 = vadd.f32 %v5082_v52, %v5137_v36  ;;  %v3018_v25 = vadd.f32 %v5104_v18, %v5150_v22 }
 0x39d   :  { %2975 = vmatprep.subr.bf16.mxu0 %v2962_v23  ;;  %3047 = vmatprep.subr.bf16.mxu1 %v3034_v49  ;;  %v3021_v37 = vadd.f32 %v3013_v41, %v5135_v35  ;;  %v2943_v32 = vadd.f32 %v5089_v21, %v5137_v36  ;;  %v3009_v13 = vmul.f32 %v5072_v58, %v5414_v6  ;;  %v2952_v51 = vmax.f32 %v2944_v40, 0.0 }
 0x39e   :  { %v2961_v63 = vpack.c.bf16 %v2957_v12, %v2955_v11  ;;  %v2954_v5 = vmax.f32 %v2946_v2, 0.0  ;;  %v3026_v50 = vmax.f32 %v3018_v25, 0.0  ;;  %v3027_v52 = vmax.f32 %v3019_v57, 0.0 }
 0x39f   :  { %3191 = vmatmul.mubr.msk.bf16.vlgmr.msra.gmra.mxu0 %vm2816_vm9, %v2741_v7  ;;  %3192 = vmatmul.mubr.msk.bf16.vlgmr.msra.gmra.mxu1 %vm2816_vm9, %v2741_v7  ;;  %v3029_v18 = vmax.f32 %v3021_v37, 0.0  ;;  %v2945_v62 = vadd.f32 %v2937_v15, %v5150_v22  ;;  %v3015_v35 = vadd.f32 %v5092_v27, %v5137_v36  ;;  %v3024_v42 = vmax.f32 %v3016_v24, 0.0  ;;  %v2814_v36 = vpop.permute.xlu1 %2813 }
 0x3a0   :  { %2976 = vmatpush1.bf16.msra.mxu0 %v2961_v63  ;;  %v2960_v21 = vpack.c.bf16 %v2954_v5, %v2952_v51  ;;  %v3017_v58 = vadd.f32 %v3009_v13, %v5150_v22  ;;  %v5415_v26 = vmov 0   ;;  %v2951_v60 = vmax.f32 %v2943_v32, 0.0 }
 0x3a1   :  { %2995 = vmatprep.mubr.bf16.mxu0 %v5415_v26  ;;  %v3033_v44 = vpack.c.bf16 %v3029_v18, %v3027_v52  ;;  %v2953_v56 = vmax.f32 %v2945_v62, 0.0  ;;  %3067 = vmatprep.mubr.bf16.mxu1 %v5415_v26  ;;  %v3032_v3 = vpack.c.bf16 %v3026_v50, %v3024_v42  ;;  %v3023_v4 = vmax.f32 %v3015_v35, 0.0 }
 0x3a2   :  { %2977 = vmatprep.subr.bf16.mxu0 %v2960_v21  ;;  %v3025_v46 = vmax.f32 %v3017_v58, 0.0 }
 0x3a3   :  { %3048 = vmatpush1.bf16.msra.mxu1 %v3033_v44  ;;  %v2959_v30 = vpack.c.bf16 %v2953_v56, %v2951_v60 }
 0x3a4   :  { %3049 = vmatprep.subr.bf16.mxu1 %v3032_v3  ;;  %v3031_v27 = vpack.c.bf16 %v3025_v46, %v3023_v4 }
 0x3a5   :  { %2978 = vmatpush1.bf16.msra.mxu0 %v2959_v30 }
 0x3a7   :  { %3050 = vmatpush1.bf16.msra.mxu1 %v3031_v27 }
 0x3a8   :  { %3193 = vmatmul.mubr.msk.bf16.vlgmr.msra.gmra.mxu0 %vm2816_vm9, %v2741_v7 }
 0x3aa   :  { %3194 = vmatmul.mubr.msk.bf16.vlgmr.msra.gmra.mxu1 %vm2816_vm9, %v2741_v7 }
 0x45f   :  { %v2854_v22 = vpop.f32.mrf.mxu0  ;;  %v2925_v16 = vpop.f32.mrf.mxu1 }
 0x460   :  { %v2855_v48 = vadd.f32 %v2854_v22, %v2814_v36  ;;  %v2926_v34 = vadd.f32 %v2925_v16, %v2814_v36 }
 0x461   :  { %v2856_v38 = vpop.f32.mrf.mxu0  ;;  %v2927_v10 = vpop.f32.mrf.mxu1 }
 0x462   :  { %2861 = vst [vmem:[#allocation2] sm:$0xff] %v2855_v48  ;;  %2933 = vst [vmem:[#allocation2 + $0x10] sm:$0xff] %v2926_v34  ;;  %v2857_v19 = vadd.f32 %v2856_v38, %v2814_v36  ;;  %v2928_v1 = vadd.f32 %v2927_v10, %v2814_v36 }
 0x463   :  { %v2858_v28 = vpop.f32.mrf.mxu0  ;;  %v2929_v45 = vpop.f32.mrf.mxu1 }
 0x464   :  { %2862 = vst [vmem:[#allocation2 + $0x8] sm:$0xff] %v2857_v19  ;;  %2934 = vst [vmem:[#allocation2 + $0x18] sm:$0xff] %v2928_v1 }
 0x465   :  { %v2859_v0 = vpop.f32.mrf.mxu0  ;;  %v2930_v29 = vpop.f32.mrf.mxu1 }
 0x468   :  { %v2997_v47 = vpop.f32.mrf.mxu0 }
 0x469   :  { %v2998_v61 = vadd.f32 %v2997_v47, %v2814_v36 }
 0x46a   :  { %v3069_v39 = vpop.f32.mrf.mxu1  ;;  %v2999_v43 = vpop.f32.mrf.mxu0 }
 0x46b   :  { %3005 = vst [vmem:[#allocation2 + $0x20] sm:$0xff] %v2998_v61  ;;  %v3070_v17 = vadd.f32 %v3069_v39, %v2814_v36  ;;  %v3000_v33 = vadd.f32 %v2999_v43, %v2814_v36 }
 0x46c   :  { %v3071_v20 = vpop.f32.mrf.mxu1  ;;  %v3001_v31 = vpop.f32.mrf.mxu0 }
 0x46d   :  { %3077 = vst [vmem:[#allocation2 + $0x30] sm:$0xff] %v3070_v17  ;;  %3006 = vst [vmem:[#allocation2 + $0x28] sm:$0xff] %v3000_v33  ;;  %v3072_v59 = vadd.f32 %v3071_v20, %v2814_v36 }
 0x46e   :  { %v3073_v53 = vpop.f32.mrf.mxu1  ;;  %v3002_v8 = vpop.f32.mrf.mxu0 }
 0x46f   :  { %3078 = vst [vmem:[#allocation2 + $0x38] sm:$0xff] %v3072_v59 }
 0x470   :  { %v3074_v9 = vpop.f32.mrf.mxu1 }
 0x471   :  { %3644 = shalt.err (!%p3641_p4)
}
 0x472   :  { %s3665_s10 = smov 256   ;;  %s3666_s11 = smov 16  }
 0x473   :  { %3090 = dma.vmem_to_hbm [thread:$0]  %s3085_s0, 1024, %s5204_s7, [#allocation3], %s3665_s10, %s3665_s10, %s3666_s11  }
 0x474   :  { %3653 = dma.done.wait [#allocation3], 1024  }
 0x475   :  { %3654 = vsyncadd [#allocation3], 4294966272 }
 0x476   :  { %3094 = vsyncpa [#allocation3], 1 }

</bundles_post_ra>
